<compile_context>
chip_gen: v5e
topology: v5e:2x2
jax: 0.10.0
libtpu: 0.0.40
codegen_flags: <defaults>
</compile_context>

<pallas_src>
from typing import NamedTuple

import jax
import jax.numpy as jnp
from jax import lax
from jax.experimental import pallas as pl
from jax.experimental.pallas import tpu as pltpu


def _round_up(x, m):
    return (x + m - 1) // m * m


def _leaky_relu(v, alpha):
    return jnp.where(v > 0, v, alpha * v)


# ----------------------------------------------------------------------------
# Parameter preparation (one-time pad + cast; avoids per-forward HBM traffic).
# ----------------------------------------------------------------------------

class PreparedParams(NamedTuple):
    w1: jax.Array          # (depth, Dp, Hp) weight_dtype
    b1: jax.Array          # (depth, 1, Hp)  float32
    w2: jax.Array          # (depth, Hp, Dp) weight_dtype
    b2: jax.Array          # (depth, 1, Dp)  float32
    input_dim: int
    hidden_dim: int


def prepare_params(params, weight_dtype=jnp.bfloat16):
    """Pad feature dims to lane multiples (128) and cast weights to the MXU
    dtype once.  Zero padding is exact: padded rows/cols and biases are zero,
    so padded activation columns stay exactly zero through the whole stack."""
    w1, b1, w2, b2 = params          # (depth,D,H),(depth,H),(depth,H,D),(depth,D)
    depth, D, H = w1.shape
    Dp, Hp = _round_up(D, 128), _round_up(H, 128)
    w1p = jnp.pad(w1, ((0, 0), (0, Dp - D), (0, Hp - H))).astype(weight_dtype)
    w2p = jnp.pad(w2, ((0, 0), (0, Hp - H), (0, Dp - D))).astype(weight_dtype)
    b1p = jnp.pad(b1, ((0, 0), (0, Hp - H))).reshape(depth, 1, Hp).astype(jnp.float32)
    b2p = jnp.pad(b2, ((0, 0), (0, Dp - D))).reshape(depth, 1, Dp).astype(jnp.float32)
    return PreparedParams(w1p, b1p, w2p, b2p, D, H)


# ----------------------------------------------------------------------------
# Heuristics (VMEM budget, row tile, residency decision).
# ----------------------------------------------------------------------------

def _vmem_limit_bytes():
    """~80% of physical VMEM (leaves room for Mosaic scratch/semaphores)."""
    try:
        cap = int(pltpu.get_tpu_info().vmem_capacity_bytes)
    except Exception:
        cap = 64 * 1024 * 1024          # conservative (v7x-sized) fallback
    return max(32 * 1024 * 1024, int(cap * 0.80))


def _pick_tm(M, Hp):
    """Big tiles amortize the ~0.35us/step overhead; keep >=2 tiles so both
    TensorCores get work, and balance rows so padded-row waste stays small."""
    if M <= 8:
        return max(M, 1)                    # full-dim block
    base = 256 if Hp >= 2048 else 512       # ease VMEM pressure for wide H
    n_tiles = max(2, pl.cdiv(M, base))
    return max(8, min(base, _round_up(pl.cdiv(M, n_tiles), 8)))


def _weights_fit_resident(depth, Dp, Hp, weight_dtype, vmem_limit):
    wbytes = depth * 2 * Dp * Hp * jnp.dtype(weight_dtype).itemsize
    bbytes = depth * (Dp + Hp) * 4
    return (wbytes + bbytes) <= int(0.45 * vmem_limit)


# ----------------------------------------------------------------------------
# Kernels.
# ----------------------------------------------------------------------------

def _make_resident_kernel(depth, alpha, has_mask, assume_binary_mask,
                          unroll_depth):
    """All `depth` layers' weights resident in VMEM; one grid axis over rows."""

    def kernel(*refs):
        if has_mask:
            x_ref, mask_ref, w1_ref, b1_ref, w2_ref, b2_ref, o_ref = refs
        else:
            x_ref, w1_ref, b1_ref, w2_ref, b2_ref, o_ref = refs

        tm, dp = x_ref.shape
        hp = w1_ref.shape[-1]
        cdt = w1_ref.dtype                          # MXU operand dtype

        x = x_ref[...].astype(jnp.float32)
        if has_mask:
            # Hoist lane-splats (JAX does not CSE broadcast_in_dim).
            mvec = mask_ref[...].astype(jnp.float32)
            m_in = jnp.broadcast_to(mvec, (tm, dp))
            m_hid = jnp.broadcast_to(mvec, (tm, hp))
            if assume_binary_mask:
                # For {0,1} masks, each layer's entry mask is a no-op after
                # the previous layer's exit mask; apply it once up front.
                x = x * m_in

        def layer(d, x):
            if has_mask and not assume_binary_mask:
                x = x * m_in
            h = jnp.dot(x.astype(cdt), w1_ref[d],
                        preferred_element_type=jnp.float32)
            h = _leaky_relu(h + b1_ref[d], alpha)
            if has_mask:
                h = h * m_hid
            y = jnp.dot(h.astype(cdt), w2_ref[d],
                        preferred_element_type=jnp.float32)
            y = _leaky_relu(y + b2_ref[d], alpha)
            if has_mask:
                y = y * m_in
            return y

        if unroll_depth:
            for d in range(depth):
                x = layer(d, x)
        else:
            # Large depth: loop (dynamic leading-axis index), no code bloat.
            x = lax.fori_loop(0, depth, layer, x)

        o_ref[...] = x.astype(o_ref.dtype)

    return kernel


def _make_streamed_kernel(depth, alpha, has_mask, assume_binary_mask):
    """Depth-streaming variant: grid (row_tiles, depth); one layer's weights
    are DMAed per step, activation lives in a resident f32 VMEM scratch."""

    def kernel(*refs):
        if has_mask:
            (x_ref, mask_ref, w1_ref, b1_ref, w2_ref, b2_ref,
             o_ref, act_ref) = refs
        else:
            x_ref, w1_ref, b1_ref, w2_ref, b2_ref, o_ref, act_ref = refs

        tm, dp = x_ref.shape
        hp = w1_ref.shape[-1]
        cdt = w1_ref.dtype
        d = pl.program_id(1)

        if has_mask:
            mvec = mask_ref[...].astype(jnp.float32)
            m_in = jnp.broadcast_to(mvec, (tm, dp))
            m_hid = jnp.broadcast_to(mvec, (tm, hp))

        @pl.when(d == 0)
        def _():
            xin = x_ref[...].astype(jnp.float32)
            if has_mask and assume_binary_mask:
                xin = xin * m_in
            act_ref[...] = xin

        x = act_ref[...]
        if has_mask and not assume_binary_mask:
            x = x * m_in
        h = jnp.dot(x.astype(cdt), w1_ref[0],
                    preferred_element_type=jnp.float32)
        h = _leaky_relu(h + b1_ref[0], alpha)
        if has_mask:
            h = h * m_hid
        y = jnp.dot(h.astype(cdt), w2_ref[0],
                    preferred_element_type=jnp.float32)
        y = _leaky_relu(y + b2_ref[0], alpha)
        if has_mask:
            y = y * m_in
        act_ref[...] = y

        @pl.when(d == depth - 1)
        def _():
            o_ref[...] = y.astype(o_ref.dtype)

    return kernel


# ----------------------------------------------------------------------------
# Forward wrapper.
# ----------------------------------------------------------------------------

def cogcore_forward(x, attention_mask, params, *, alpha=0.01, tm=None,
                    weight_dtype=jnp.bfloat16, assume_binary_mask=False,
                    stream_weights=None, unroll_depth_max=8):
    """x: (B, S, D); attention_mask: (B, S, 1) or None.

    `params` may be the raw tuple from init_params or a PreparedParams
    (prefer preparing once, outside the step, to avoid per-call pad/cast).
    `assume_binary_mask=True` drops the redundant per-layer entry mask; this
    is exact only for {0,1} masks (default False preserves PyTorch ordering).
    """
    B, S, D = x.shape
    if not isinstance(params, PreparedParams):
        params = prepare_params(params, weight_dtype=weight_dtype)
    w1p, b1p, w2p, b2p, pD, _ = params
    assert pD == D, "params were prepared for a different input_dim"
    depth, Dp, Hp = w1p.shape
    M = B * S

    vmem_limit = _vmem_limit_bytes()
    if stream_weights is None:
        stream_weights = not _weights_fit_resident(depth, Dp, Hp, w1p.dtype,
                                                   vmem_limit)
    if tm is None:
        tm = _pick_tm(M, Hp)
    n_row_tiles = pl.cdiv(M, tm)

    has_mask = attention_mask is not None

    # No row padding: ragged M handled by a cdiv grid + partial last tile
    # (rows are independent, so garbage in the padded region never leaks).
    # Columns are padded only when D is not already a lane multiple.
    x2 = x.reshape(M, D)
    if Dp != D:
        x2 = jnp.pad(x2, ((0, 0), (0, Dp - D)))
    inputs = [x2]
    if has_mask:
        inputs.append(attention_mask.reshape(M, 1))

    out_shape = jax.ShapeDtypeStruct((M, Dp), x.dtype)

    def run(weight_pipeline_mode):
        if stream_weights:
            kernel = _make_streamed_kernel(depth, alpha, has_mask,
                                           assume_binary_mask)
            grid = (n_row_tiles, depth)
            in_specs = [pl.BlockSpec((tm, Dp), lambda i, d: (i, 0))]
            if has_mask:
                in_specs.append(pl.BlockSpec((tm, 1), lambda i, d: (i, 0)))
            in_specs += [
                pl.BlockSpec((1, Dp, Hp), lambda i, d: (d, 0, 0)),   # w1[d]
                pl.BlockSpec((1, 1, Hp), lambda i, d: (d, 0, 0)),    # b1[d]
                pl.BlockSpec((1, Hp, Dp), lambda i, d: (d, 0, 0)),   # w2[d]
                pl.BlockSpec((1, 1, Dp), lambda i, d: (d, 0, 0)),    # b2[d]
            ]
            out_spec = pl.BlockSpec((tm, Dp), lambda i, d: (i, 0))
            scratch = (pltpu.VMEM((tm, Dp), jnp.float32),)
            semantics = ("parallel", "arbitrary")
        else:
            kernel = _make_resident_kernel(
                depth, alpha, has_mask, assume_binary_mask,
                unroll_depth=(depth <= unroll_depth_max))
            grid = (n_row_tiles,)

            def wspec(shape):
                zero = lambda i: (0,) * len(shape)
                if weight_pipeline_mode is None:
                    return pl.BlockSpec(shape, zero)
                return pl.BlockSpec(shape, zero,
                                    pipeline_mode=weight_pipeline_mode)

            in_specs = [pl.BlockSpec((tm, Dp), lambda i: (i, 0))]
            if has_mask:
                in_specs.append(pl.BlockSpec((tm, 1), lambda i: (i, 0)))
            in_specs += [
                wspec((depth, Dp, Hp)),     # w1 stack (VMEM-resident)
                wspec((depth, 1, Hp)),      # b1
                wspec((depth, Hp, Dp)),     # w2 stack (VMEM-resident)
                wspec((depth, 1, Dp)),      # b2
            ]
            out_spec = pl.BlockSpec((tm, Dp), lambda i: (i, 0))
            scratch = ()
            semantics = ("parallel",)

        return pl.pallas_call(
            kernel,
            out_shape=out_shape,
            grid_spec=pltpu.PrefetchScalarGridSpec(
                num_scalar_prefetch=0,
                grid=grid,
                in_specs=in_specs,
                out_specs=out_spec,
                scratch_shapes=scratch,
            ),
            compiler_params=pltpu.CompilerParams(
                dimension_semantics=semantics,
                vmem_limit_bytes=int(vmem_limit)),
        )(*inputs, w1p, b1p, w2p, b2p)

    if stream_weights:
        out2 = run(None)
    else:
        try:
            # Constant-index weight specs never re-DMA; single-buffer them to
            # halve their resident VMEM footprint.
            out2 = run(pl.Buffered(1))
        except Exception:
            out2 = run(None)

    if Dp != D:
        out2 = out2[:, :D]
    return out2.reshape(B, S, D)


# ----------------------------------------------------------------------------
# Init + plain-JAX reference (mirrors the PyTorch module).
# ----------------------------------------------------------------------------

def init_params(key, input_dim, hidden_dim, depth):
    """Deterministic init mimicking torch.nn.Linear's uniform(-1/sqrt(fan_in), ...)."""
    ks = jax.random.split(key, 4 * depth)
    w1, b1, w2, b2 = [], [], [], []
    for d in range(depth):
        lim1 = 1.0 / (input_dim ** 0.5)
        lim2 = 1.0 / (hidden_dim ** 0.5)
        w1.append(jax.random.uniform(ks[4 * d + 0], (input_dim, hidden_dim),
                                     jnp.float32, -lim1, lim1))
        b1.append(jax.random.uniform(ks[4 * d + 1], (hidden_dim,),
                                     jnp.float32, -lim1, lim1))
        w2.append(jax.random.uniform(ks[4 * d + 2], (hidden_dim, input_dim),
                                     jnp.float32, -lim2, lim2))
        b2.append(jax.random.uniform(ks[4 * d + 3], (input_dim,),
                                     jnp.float32, -lim2, lim2))
    return (jnp.stack(w1), jnp.stack(b1), jnp.stack(w2), jnp.stack(b2))


def cogcore_reference(x, attention_mask, params, alpha=0.01,
                      compute_dtype=jnp.float32):
    """Plain-JAX reference matching the PyTorch forward exactly."""
    w1, b1, w2, b2 = params
    depth = w1.shape[0]
    x = x.astype(jnp.float32)
    for d in range(depth):
        if attention_mask is not None:
            x = x * attention_mask
        h = jnp.einsum("bsd,dh->bsh", x.astype(compute_dtype),
                       w1[d].astype(compute_dtype),
                       preferred_element_type=jnp.float32) + b1[d]
        h = _leaky_relu(h, alpha)
        if attention_mask is not None:
            h = h * attention_mask
        y = jnp.einsum("bsh,hd->bsd", h.astype(compute_dtype),
                       w2[d].astype(compute_dtype),
                       preferred_element_type=jnp.float32) + b2[d]
        y = _leaky_relu(y, alpha)
        if attention_mask is not None:
            y = y * attention_mask
        x = y
    return x


if __name__ == "__main__":
    key = jax.random.PRNGKey(0)
    B, S, D, H, depth, alpha = 2, 8, 32, 64, 3, 0.01

    kx, km, kp = jax.random.split(key, 3)
    x = jax.random.normal(kx, (B, S, D), jnp.float32)
    # binary attention mask over sequence positions, broadcast over features
    attention_mask = (jax.random.uniform(km, (B, S, 1)) > 0.2).astype(jnp.float32)
    params = init_params(kp, D, H, depth)

    # Prepare (pad + cast) weights ONCE, outside the forward.
    params_bf16 = prepare_params(params, weight_dtype=jnp.bfloat16)
    params_f32 = prepare_params(params, weight_dtype=jnp.float32)

    # 1) Default hot path: resident bf16 weights, binary-mask fast path.
    out = jax.block_until_ready(
        cogcore_forward(x, attention_mask, params_bf16, alpha=alpha,
                        assume_binary_mask=True))
    ref = cogcore_reference(x, attention_mask, params, alpha=alpha,
                            compute_dtype=jnp.bfloat16)
    assert out.shape == (B, S, D)
    assert jnp.allclose(out, ref, atol=2e-3, rtol=2e-3), "bf16 resident mismatch"

    # 2) f32 weights, exact PyTorch mask ordering (tight check).
    out = jax.block_until_ready(
        cogcore_forward(x, attention_mask, params_f32, alpha=alpha))
    ref = cogcore_reference(x, attention_mask, params, alpha=alpha)
    assert jnp.allclose(out, ref, atol=1e-5, rtol=1e-5), "f32 resident mismatch"

    # 3) Depth-streaming path (one layer's weights DMAed per grid step).
    out = jax.block_until_ready(
        cogcore_forward(x, attention_mask, params_f32, alpha=alpha,
                        stream_weights=True))
    assert jnp.allclose(out, ref, atol=1e-5, rtol=1e-5), "f32 streamed mismatch"

    # 4) No-mask path, exercising the lax.fori_loop depth loop.
    out = jax.block_until_ready(
        cogcore_forward(x, None, params_f32, alpha=alpha, unroll_depth_max=0))
    refn = cogcore_reference(x, None, params, alpha=alpha)
    assert jnp.allclose(out, refn, atol=1e-5, rtol=1e-5), "maskless mismatch"

    # 5) Ragged row count (M not a multiple of the row tile) via cdiv grid.
    xr, mr = x[:, :5, :], attention_mask[:, :5, :]
    out = jax.block_until_ready(
        cogcore_forward(xr, mr, params_f32, alpha=alpha))
    refr = cogcore_reference(xr, mr, params, alpha=alpha)
    assert jnp.allclose(out, refr, atol=1e-5, rtol=1e-5), "ragged-M mismatch"

    # TODO(synk): optional bf16 activation streaming at the pallas_call
    #             boundary (halves activation HBM traffic in the mem-bound
    #             regime) is not enabled by default to keep output dtype == x.dtype.
    print("KERNEL_OK")
</pallas_src>

<mosaic_0001>
module attributes {stable_mosaic.version = 11 : i64} {
  func.func @kernel(%arg0: i32, %arg1: memref<8x128xf32, #tpu.memory_space<vmem>>, %arg2: memref<8x1xf32, #tpu.memory_space<vmem>>, %arg3: memref<3x128x128xbf16, #tpu.memory_space<vmem>>, %arg4: memref<3x1x128xf32, #tpu.memory_space<vmem>>, %arg5: memref<3x128x128xbf16, #tpu.memory_space<vmem>>, %arg6: memref<3x1x128xf32, #tpu.memory_space<vmem>>, %arg7: memref<8x128xf32, #tpu.memory_space<vmem>>) attributes {dimension_semantics = [#tpu.dimension_semantics<parallel>], iteration_bounds = array<i64: 2>, scalar_prefetch = 0 : i64, scratch_operands = 0 : i64, tpu.core_type = #tpu.core_type<tc>, window_params = [{transform_indices = @transform_0, window_bounds = array<i64: 8, 128>}, {transform_indices = @transform_1, window_bounds = array<i64: 8, 1>}, {pipeline_mode = #tpu.pipeline_mode<synchronous>, transform_indices = @transform_2, window_bounds = array<i64: 3, 128, 128>}, {pipeline_mode = #tpu.pipeline_mode<synchronous>, transform_indices = @transform_3, window_bounds = array<i64: 3, 1, 128>}, {pipeline_mode = #tpu.pipeline_mode<synchronous>, transform_indices = @transform_4, window_bounds = array<i64: 3, 128, 128>}, {pipeline_mode = #tpu.pipeline_mode<synchronous>, transform_indices = @transform_5, window_bounds = array<i64: 3, 1, 128>}, {transform_indices = @transform_6, window_bounds = array<i64: 8, 128>}]} {
    %c0 = arith.constant 0 : index
    %c0_0 = arith.constant 0 : index
    %0 = vector.load %arg1[%c0, %c0_0] : memref<8x128xf32, #tpu.memory_space<vmem>>, vector<8x128xf32>
    %c0_1 = arith.constant 0 : index
    %c0_2 = arith.constant 0 : index
    %1 = vector.load %arg2[%c0_1, %c0_2] : memref<8x1xf32, #tpu.memory_space<vmem>>, vector<8x1xf32>
    %2 = vector.shape_cast %1 : vector<8x1xf32> to vector<8x1xf32>
    %3 = vector.broadcast %2 : vector<8x1xf32> to vector<8x128xf32>
    %4 = vector.shape_cast %1 : vector<8x1xf32> to vector<8x1xf32>
    %5 = vector.broadcast %4 : vector<8x1xf32> to vector<8x128xf32>
    %6 = arith.mulf %0, %3 : vector<8x128xf32>
    %7 = arith.truncf %6 : vector<8x128xf32> to vector<8x128xbf16>
    %c0_3 = arith.constant 0 : index
    %c0_4 = arith.constant 0 : index
    %c0_5 = arith.constant 0 : index
    %8 = vector.load %arg3[%c0_3, %c0_4, %c0_5] : memref<3x128x128xbf16, #tpu.memory_space<vmem>>, vector<1x128x128xbf16>
    %9 = vector.shape_cast %8 : vector<1x128x128xbf16> to vector<128x128xbf16>
    %cst = arith.constant dense<0.000000e+00> : vector<8x128xf32>
    %10 = tpu.matmul %7, %9, %cst {dimension_numbers = #tpu.dot_dimension_numbers<[1], [0], [0], [1], [0, 0, 1, 1], [], []>} : vector<8x128xbf16>, vector<128x128xbf16>, vector<8x128xf32> -> vector<8x128xf32>
    %c0_6 = arith.constant 0 : index
    %c0_7 = arith.constant 0 : index
    %c0_8 = arith.constant 0 : index
    %11 = vector.load %arg4[%c0_6, %c0_7, %c0_8] : memref<3x1x128xf32, #tpu.memory_space<vmem>>, vector<1x1x128xf32>
    %12 = vector.shape_cast %11 : vector<1x1x128xf32> to vector<1x128xf32>
    %13 = vector.broadcast %12 : vector<1x128xf32> to vector<8x128xf32>
    %14 = arith.addf %10, %13 : vector<8x128xf32>
    %cst_9 = arith.constant 0.000000e+00 : f32
    %15 = vector.broadcast %cst_9 : f32 to vector<8x128xf32>
    %16 = arith.cmpf ogt, %14, %15 : vector<8x128xf32>
    %cst_10 = arith.constant 0.00999999977 : f32
    %17 = vector.broadcast %cst_10 : f32 to vector<8x128xf32>
    %18 = arith.mulf %17, %14 : vector<8x128xf32>
    %19 = arith.select %16, %14, %18 : vector<8x128xi1>, vector<8x128xf32>
    %20 = arith.mulf %19, %5 : vector<8x128xf32>
    %21 = arith.truncf %20 : vector<8x128xf32> to vector<8x128xbf16>
    %c0_11 = arith.constant 0 : index
    %c0_12 = arith.constant 0 : index
    %c0_13 = arith.constant 0 : index
    %22 = vector.load %arg5[%c0_11, %c0_12, %c0_13] : memref<3x128x128xbf16, #tpu.memory_space<vmem>>, vector<1x128x128xbf16>
    %23 = vector.shape_cast %22 : vector<1x128x128xbf16> to vector<128x128xbf16>
    %cst_14 = arith.constant dense<0.000000e+00> : vector<8x128xf32>
    %24 = tpu.matmul %21, %23, %cst_14 {dimension_numbers = #tpu.dot_dimension_numbers<[1], [0], [0], [1], [0, 0, 1, 1], [], []>} : vector<8x128xbf16>, vector<128x128xbf16>, vector<8x128xf32> -> vector<8x128xf32>
    %c0_15 = arith.constant 0 : index
    %c0_16 = arith.constant 0 : index
    %c0_17 = arith.constant 0 : index
    %25 = vector.load %arg6[%c0_15, %c0_16, %c0_17] : memref<3x1x128xf32, #tpu.memory_space<vmem>>, vector<1x1x128xf32>
    %26 = vector.shape_cast %25 : vector<1x1x128xf32> to vector<1x128xf32>
    %27 = vector.broadcast %26 : vector<1x128xf32> to vector<8x128xf32>
    %28 = arith.addf %24, %27 : vector<8x128xf32>
    %cst_18 = arith.constant 0.000000e+00 : f32
    %29 = vector.broadcast %cst_18 : f32 to vector<8x128xf32>
    %30 = arith.cmpf ogt, %28, %29 : vector<8x128xf32>
    %cst_19 = arith.constant 0.00999999977 : f32
    %31 = vector.broadcast %cst_19 : f32 to vector<8x128xf32>
    %32 = arith.mulf %31, %28 : vector<8x128xf32>
    %33 = arith.select %30, %28, %32 : vector<8x128xi1>, vector<8x128xf32>
    %34 = arith.mulf %33, %3 : vector<8x128xf32>
    %35 = arith.truncf %34 : vector<8x128xf32> to vector<8x128xbf16>
    %c1 = arith.constant 1 : index
    %c0_20 = arith.constant 0 : index
    %c0_21 = arith.constant 0 : index
    %36 = vector.load %arg3[%c1, %c0_20, %c0_21] : memref<3x128x128xbf16, #tpu.memory_space<vmem>>, vector<1x128x128xbf16>
    %37 = vector.shape_cast %36 : vector<1x128x128xbf16> to vector<128x128xbf16>
    %cst_22 = arith.constant dense<0.000000e+00> : vector<8x128xf32>
    %38 = tpu.matmul %35, %37, %cst_22 {dimension_numbers = #tpu.dot_dimension_numbers<[1], [0], [0], [1], [0, 0, 1, 1], [], []>} : vector<8x128xbf16>, vector<128x128xbf16>, vector<8x128xf32> -> vector<8x128xf32>
    %c1_23 = arith.constant 1 : index
    %c0_24 = arith.constant 0 : index
    %c0_25 = arith.constant 0 : index
    %39 = vector.load %arg4[%c1_23, %c0_24, %c0_25] : memref<3x1x128xf32, #tpu.memory_space<vmem>>, vector<1x1x128xf32>
    %40 = vector.shape_cast %39 : vector<1x1x128xf32> to vector<1x128xf32>
    %41 = vector.broadcast %40 : vector<1x128xf32> to vector<8x128xf32>
    %42 = arith.addf %38, %41 : vector<8x128xf32>
    %cst_26 = arith.constant 0.000000e+00 : f32
    %43 = vector.broadcast %cst_26 : f32 to vector<8x128xf32>
    %44 = arith.cmpf ogt, %42, %43 : vector<8x128xf32>
    %cst_27 = arith.constant 0.00999999977 : f32
    %45 = vector.broadcast %cst_27 : f32 to vector<8x128xf32>
    %46 = arith.mulf %45, %42 : vector<8x128xf32>
    %47 = arith.select %44, %42, %46 : vector<8x128xi1>, vector<8x128xf32>
    %48 = arith.mulf %47, %5 : vector<8x128xf32>
    %49 = arith.truncf %48 : vector<8x128xf32> to vector<8x128xbf16>
    %c1_28 = arith.constant 1 : index
    %c0_29 = arith.constant 0 : index
    %c0_30 = arith.constant 0 : index
    %50 = vector.load %arg5[%c1_28, %c0_29, %c0_30] : memref<3x128x128xbf16, #tpu.memory_space<vmem>>, vector<1x128x128xbf16>
    %51 = vector.shape_cast %50 : vector<1x128x128xbf16> to vector<128x128xbf16>
    %cst_31 = arith.constant dense<0.000000e+00> : vector<8x128xf32>
    %52 = tpu.matmul %49, %51, %cst_31 {dimension_numbers = #tpu.dot_dimension_numbers<[1], [0], [0], [1], [0, 0, 1, 1], [], []>} : vector<8x128xbf16>, vector<128x128xbf16>, vector<8x128xf32> -> vector<8x128xf32>
    %c1_32 = arith.constant 1 : index
    %c0_33 = arith.constant 0 : index
    %c0_34 = arith.constant 0 : index
    %53 = vector.load %arg6[%c1_32, %c0_33, %c0_34] : memref<3x1x128xf32, #tpu.memory_space<vmem>>, vector<1x1x128xf32>
    %54 = vector.shape_cast %53 : vector<1x1x128xf32> to vector<1x128xf32>
    %55 = vector.broadcast %54 : vector<1x128xf32> to vector<8x128xf32>
    %56 = arith.addf %52, %55 : vector<8x128xf32>
    %cst_35 = arith.constant 0.000000e+00 : f32
    %57 = vector.broadcast %cst_35 : f32 to vector<8x128xf32>
    %58 = arith.cmpf ogt, %56, %57 : vector<8x128xf32>
    %cst_36 = arith.constant 0.00999999977 : f32
    %59 = vector.broadcast %cst_36 : f32 to vector<8x128xf32>
    %60 = arith.mulf %59, %56 : vector<8x128xf32>
    %61 = arith.select %58, %56, %60 : vector<8x128xi1>, vector<8x128xf32>
    %62 = arith.mulf %61, %3 : vector<8x128xf32>
    %63 = arith.truncf %62 : vector<8x128xf32> to vector<8x128xbf16>
    %c2 = arith.constant 2 : index
    %c0_37 = arith.constant 0 : index
    %c0_38 = arith.constant 0 : index
    %64 = vector.load %arg3[%c2, %c0_37, %c0_38] : memref<3x128x128xbf16, #tpu.memory_space<vmem>>, vector<1x128x128xbf16>
    %65 = vector.shape_cast %64 : vector<1x128x128xbf16> to vector<128x128xbf16>
    %cst_39 = arith.constant dense<0.000000e+00> : vector<8x128xf32>
    %66 = tpu.matmul %63, %65, %cst_39 {dimension_numbers = #tpu.dot_dimension_numbers<[1], [0], [0], [1], [0, 0, 1, 1], [], []>} : vector<8x128xbf16>, vector<128x128xbf16>, vector<8x128xf32> -> vector<8x128xf32>
    %c2_40 = arith.constant 2 : index
    %c0_41 = arith.constant 0 : index
    %c0_42 = arith.constant 0 : index
    %67 = vector.load %arg4[%c2_40, %c0_41, %c0_42] : memref<3x1x128xf32, #tpu.memory_space<vmem>>, vector<1x1x128xf32>
    %68 = vector.shape_cast %67 : vector<1x1x128xf32> to vector<1x128xf32>
    %69 = vector.broadcast %68 : vector<1x128xf32> to vector<8x128xf32>
    %70 = arith.addf %66, %69 : vector<8x128xf32>
    %cst_43 = arith.constant 0.000000e+00 : f32
    %71 = vector.broadcast %cst_43 : f32 to vector<8x128xf32>
    %72 = arith.cmpf ogt, %70, %71 : vector<8x128xf32>
    %cst_44 = arith.constant 0.00999999977 : f32
    %73 = vector.broadcast %cst_44 : f32 to vector<8x128xf32>
    %74 = arith.mulf %73, %70 : vector<8x128xf32>
    %75 = arith.select %72, %70, %74 : vector<8x128xi1>, vector<8x128xf32>
    %76 = arith.mulf %75, %5 : vector<8x128xf32>
    %77 = arith.truncf %76 : vector<8x128xf32> to vector<8x128xbf16>
    %c2_45 = arith.constant 2 : index
    %c0_46 = arith.constant 0 : index
    %c0_47 = arith.constant 0 : index
    %78 = vector.load %arg5[%c2_45, %c0_46, %c0_47] : memref<3x128x128xbf16, #tpu.memory_space<vmem>>, vector<1x128x128xbf16>
    %79 = vector.shape_cast %78 : vector<1x128x128xbf16> to vector<128x128xbf16>
    %cst_48 = arith.constant dense<0.000000e+00> : vector<8x128xf32>
    %80 = tpu.matmul %77, %79, %cst_48 {dimension_numbers = #tpu.dot_dimension_numbers<[1], [0], [0], [1], [0, 0, 1, 1], [], []>} : vector<8x128xbf16>, vector<128x128xbf16>, vector<8x128xf32> -> vector<8x128xf32>
    %c2_49 = arith.constant 2 : index
    %c0_50 = arith.constant 0 : index
    %c0_51 = arith.constant 0 : index
    %81 = vector.load %arg6[%c2_49, %c0_50, %c0_51] : memref<3x1x128xf32, #tpu.memory_space<vmem>>, vector<1x1x128xf32>
    %82 = vector.shape_cast %81 : vector<1x1x128xf32> to vector<1x128xf32>
    %83 = vector.broadcast %82 : vector<1x128xf32> to vector<8x128xf32>
    %84 = arith.addf %80, %83 : vector<8x128xf32>
    %cst_52 = arith.constant 0.000000e+00 : f32
    %85 = vector.broadcast %cst_52 : f32 to vector<8x128xf32>
    %86 = arith.cmpf ogt, %84, %85 : vector<8x128xf32>
    %cst_53 = arith.constant 0.00999999977 : f32
    %87 = vector.broadcast %cst_53 : f32 to vector<8x128xf32>
    %88 = arith.mulf %87, %84 : vector<8x128xf32>
    %89 = arith.select %86, %84, %88 : vector<8x128xi1>, vector<8x128xf32>
    %90 = arith.mulf %89, %3 : vector<8x128xf32>
    %c0_54 = arith.constant 0 : index
    %c0_55 = arith.constant 0 : index
    %91 = vector.load %arg7[%c0_54, %c0_55] : memref<8x128xf32, #tpu.memory_space<vmem>>, vector<8x128xf32>
    tpu.vector_store %arg7[%c0_54, %c0_55], %90 {strides = array<i32>} : memref<8x128xf32, #tpu.memory_space<vmem>>, vector<8x128xf32>,
    return
  }
  func.func @transform_0(%arg0: i32) -> (i32, i32) {
    %c0_i32 = arith.constant 0 : i32
    %c0_i32_0 = arith.constant 0 : i32
    return %arg0, %c0_i32 : i32, i32
  }
  func.func @transform_1(%arg0: i32) -> (i32, i32) {
    %c0_i32 = arith.constant 0 : i32
    %c0_i32_0 = arith.constant 0 : i32
    return %arg0, %c0_i32 : i32, i32
  }
  func.func @transform_2(%arg0: i32) -> (i32, i32, i32) {
    %c0_i32 = arith.constant 0 : i32
    %c0_i32_0 = arith.constant 0 : i32
    %c0_i32_1 = arith.constant 0 : i32
    %c0_i32_2 = arith.constant 0 : i32
    return %c0_i32, %c0_i32_0, %c0_i32_1 : i32, i32, i32
  }
  func.func @transform_3(%arg0: i32) -> (i32, i32, i32) {
    %c0_i32 = arith.constant 0 : i32
    %c0_i32_0 = arith.constant 0 : i32
    %c0_i32_1 = arith.constant 0 : i32
    %c0_i32_2 = arith.constant 0 : i32
    return %c0_i32, %c0_i32_0, %c0_i32_1 : i32, i32, i32
  }
  func.func @transform_4(%arg0: i32) -> (i32, i32, i32) {
    %c0_i32 = arith.constant 0 : i32
    %c0_i32_0 = arith.constant 0 : i32
    %c0_i32_1 = arith.constant 0 : i32
    %c0_i32_2 = arith.constant 0 : i32
    return %c0_i32, %c0_i32_0, %c0_i32_1 : i32, i32, i32
  }
  func.func @transform_5(%arg0: i32) -> (i32, i32, i32) {
    %c0_i32 = arith.constant 0 : i32
    %c0_i32_0 = arith.constant 0 : i32
    %c0_i32_1 = arith.constant 0 : i32
    %c0_i32_2 = arith.constant 0 : i32
    return %c0_i32, %c0_i32_0, %c0_i32_1 : i32, i32, i32
  }
  func.func @transform_6(%arg0: i32) -> (i32, i32) {
    %c0_i32 = arith.constant 0 : i32
    %c0_i32_0 = arith.constant 0 : i32
    return %arg0, %c0_i32 : i32, i32
  }
}

module attributes {stable_mosaic.version = 11 : i64} {
  func.func @kernel(%arg0: i32, %arg1: memref<8x128xf32, #tpu.memory_space<vmem>>, %arg2: memref<8x1xf32, #tpu.memory_space<vmem>>, %arg3: memref<3x128x128xbf16, #tpu.memory_space<vmem>>, %arg4: memref<3x1x128xf32, #tpu.memory_space<vmem>>, %arg5: memref<3x128x128xbf16, #tpu.memory_space<vmem>>, %arg6: memref<3x1x128xf32, #tpu.memory_space<vmem>>, %arg7: memref<8x128xf32, #tpu.memory_space<vmem>>) attributes {dimension_semantics = [#tpu.dimension_semantics<parallel>], iteration_bounds = array<i64: 2>, scalar_prefetch = 0 : i64, scratch_operands = 0 : i64, tpu.core_type = #tpu.core_type<tc>, window_params = [{transform_indices = @transform_0, window_bounds = array<i64: 8, 128>}, {transform_indices = @transform_1, window_bounds = array<i64: 8, 1>}, {pipeline_mode = #tpu.pipeline_mode<synchronous>, transform_indices = @transform_2, window_bounds = array<i64: 3, 128, 128>}, {pipeline_mode = #tpu.pipeline_mode<synchronous>, transform_indices = @transform_3, window_bounds = array<i64: 3, 1, 128>}, {pipeline_mode = #tpu.pipeline_mode<synchronous>, transform_indices = @transform_4, window_bounds = array<i64: 3, 128, 128>}, {pipeline_mode = #tpu.pipeline_mode<synchronous>, transform_indices = @transform_5, window_bounds = array<i64: 3, 1, 128>}, {transform_indices = @transform_6, window_bounds = array<i64: 8, 128>}]} {
    %c0 = arith.constant 0 : index
    %c0_0 = arith.constant 0 : index
    %0 = vector.load %arg1[%c0, %c0_0] : memref<8x128xf32, #tpu.memory_space<vmem>>, vector<8x128xf32>
    %c0_1 = arith.constant 0 : index
    %c0_2 = arith.constant 0 : index
    %1 = vector.load %arg2[%c0_1, %c0_2] : memref<8x1xf32, #tpu.memory_space<vmem>>, vector<8x1xf32>
    %2 = vector.shape_cast %1 : vector<8x1xf32> to vector<8x1xf32>
    %3 = vector.broadcast %2 : vector<8x1xf32> to vector<8x128xf32>
    %4 = vector.shape_cast %1 : vector<8x1xf32> to vector<8x1xf32>
    %5 = vector.broadcast %4 : vector<8x1xf32> to vector<8x128xf32>
    %6 = arith.mulf %0, %3 : vector<8x128xf32>
    %7 = arith.truncf %6 : vector<8x128xf32> to vector<8x128xbf16>
    %c0_3 = arith.constant 0 : index
    %c0_4 = arith.constant 0 : index
    %c0_5 = arith.constant 0 : index
    %8 = vector.load %arg3[%c0_3, %c0_4, %c0_5] : memref<3x128x128xbf16, #tpu.memory_space<vmem>>, vector<1x128x128xbf16>
    %9 = vector.shape_cast %8 : vector<1x128x128xbf16> to vector<128x128xbf16>
    %cst = arith.constant dense<0.000000e+00> : vector<8x128xf32>
    %10 = tpu.matmul %7, %9, %cst {dimension_numbers = #tpu.dot_dimension_numbers<[1], [0], [0], [1], [0, 0, 1, 1], [], []>} : vector<8x128xbf16>, vector<128x128xbf16>, vector<8x128xf32> -> vector<8x128xf32>
    %c0_6 = arith.constant 0 : index
    %c0_7 = arith.constant 0 : index
    %c0_8 = arith.constant 0 : index
    %11 = vector.load %arg4[%c0_6, %c0_7, %c0_8] : memref<3x1x128xf32, #tpu.memory_space<vmem>>, vector<1x1x128xf32>
    %12 = vector.shape_cast %11 : vector<1x1x128xf32> to vector<1x128xf32>
    %13 = vector.broadcast %12 : vector<1x128xf32> to vector<8x128xf32>
    %14 = arith.addf %10, %13 : vector<8x128xf32>
    %cst_9 = arith.constant 0.000000e+00 : f32
    %15 = vector.broadcast %cst_9 : f32 to vector<8x128xf32>
    %16 = arith.cmpf ogt, %14, %15 : vector<8x128xf32>
    %cst_10 = arith.constant 0.00999999977 : f32
    %17 = vector.broadcast %cst_10 : f32 to vector<8x128xf32>
    %18 = arith.mulf %17, %14 : vector<8x128xf32>
    %19 = arith.select %16, %14, %18 : vector<8x128xi1>, vector<8x128xf32>
    %20 = arith.mulf %19, %5 : vector<8x128xf32>
    %21 = arith.truncf %20 : vector<8x128xf32> to vector<8x128xbf16>
    %c0_11 = arith.constant 0 : index
    %c0_12 = arith.constant 0 : index
    %c0_13 = arith.constant 0 : index
    %22 = vector.load %arg5[%c0_11, %c0_12, %c0_13] : memref<3x128x128xbf16, #tpu.memory_space<vmem>>, vector<1x128x128xbf16>
    %23 = vector.shape_cast %22 : vector<1x128x128xbf16> to vector<128x128xbf16>
    %cst_14 = arith.constant dense<0.000000e+00> : vector<8x128xf32>
    %24 = tpu.matmul %21, %23, %cst_14 {dimension_numbers = #tpu.dot_dimension_numbers<[1], [0], [0], [1], [0, 0, 1, 1], [], []>} : vector<8x128xbf16>, vector<128x128xbf16>, vector<8x128xf32> -> vector<8x128xf32>
    %c0_15 = arith.constant 0 : index
    %c0_16 = arith.constant 0 : index
    %c0_17 = arith.constant 0 : index
    %25 = vector.load %arg6[%c0_15, %c0_16, %c0_17] : memref<3x1x128xf32, #tpu.memory_space<vmem>>, vector<1x1x128xf32>
    %26 = vector.shape_cast %25 : vector<1x1x128xf32> to vector<1x128xf32>
    %27 = vector.broadcast %26 : vector<1x128xf32> to vector<8x128xf32>
    %28 = arith.addf %24, %27 : vector<8x128xf32>
    %cst_18 = arith.constant 0.000000e+00 : f32
    %29 = vector.broadcast %cst_18 : f32 to vector<8x128xf32>
    %30 = arith.cmpf ogt, %28, %29 : vector<8x128xf32>
    %cst_19 = arith.constant 0.00999999977 : f32
    %31 = vector.broadcast %cst_19 : f32 to vector<8x128xf32>
    %32 = arith.mulf %31, %28 : vector<8x128xf32>
    %33 = arith.select %30, %28, %32 : vector<8x128xi1>, vector<8x128xf32>
    %34 = arith.mulf %33, %3 : vector<8x128xf32>
    %35 = arith.truncf %34 : vector<8x128xf32> to vector<8x128xbf16>
    %c1 = arith.constant 1 : index
    %c0_20 = arith.constant 0 : index
    %c0_21 = arith.constant 0 : index
    %36 = vector.load %arg3[%c1, %c0_20, %c0_21] : memref<3x128x128xbf16, #tpu.memory_space<vmem>>, vector<1x128x128xbf16>
    %37 = vector.shape_cast %36 : vector<1x128x128xbf16> to vector<128x128xbf16>
    %cst_22 = arith.constant dense<0.000000e+00> : vector<8x128xf32>
    %38 = tpu.matmul %35, %37, %cst_22 {dimension_numbers = #tpu.dot_dimension_numbers<[1], [0], [0], [1], [0, 0, 1, 1], [], []>} : vector<8x128xbf16>, vector<128x128xbf16>, vector<8x128xf32> -> vector<8x128xf32>
    %c1_23 = arith.constant 1 : index
    %c0_24 = arith.constant 0 : index
    %c0_25 = arith.constant 0 : index
    %39 = vector.load %arg4[%c1_23, %c0_24, %c0_25] : memref<3x1x128xf32, #tpu.memory_space<vmem>>, vector<1x1x128xf32>
    %40 = vector.shape_cast %39 : vector<1x1x128xf32> to vector<1x128xf32>
    %41 = vector.broadcast %40 : vector<1x128xf32> to vector<8x128xf32>
    %42 = arith.addf %38, %41 : vector<8x128xf32>
    %cst_26 = arith.constant 0.000000e+00 : f32
    %43 = vector.broadcast %cst_26 : f32 to vector<8x128xf32>
    %44 = arith.cmpf ogt, %42, %43 : vector<8x128xf32>
    %cst_27 = arith.constant 0.00999999977 : f32
    %45 = vector.broadcast %cst_27 : f32 to vector<8x128xf32>
    %46 = arith.mulf %45, %42 : vector<8x128xf32>
    %47 = arith.select %44, %42, %46 : vector<8x128xi1>, vector<8x128xf32>
    %48 = arith.mulf %47, %5 : vector<8x128xf32>
    %49 = arith.truncf %48 : vector<8x128xf32> to vector<8x128xbf16>
    %c1_28 = arith.constant 1 : index
    %c0_29 = arith.constant 0 : index
    %c0_30 = arith.constant 0 : index
    %50 = vector.load %arg5[%c1_28, %c0_29, %c0_30] : memref<3x128x128xbf16, #tpu.memory_space<vmem>>, vector<1x128x128xbf16>
    %51 = vector.shape_cast %50 : vector<1x128x128xbf16> to vector<128x128xbf16>
    %cst_31 = arith.constant dense<0.000000e+00> : vector<8x128xf32>
    %52 = tpu.matmul %49, %51, %cst_31 {dimension_numbers = #tpu.dot_dimension_numbers<[1], [0], [0], [1], [0, 0, 1, 1], [], []>} : vector<8x128xbf16>, vector<128x128xbf16>, vector<8x128xf32> -> vector<8x128xf32>
    %c1_32 = arith.constant 1 : index
    %c0_33 = arith.constant 0 : index
    %c0_34 = arith.constant 0 : index
    %53 = vector.load %arg6[%c1_32, %c0_33, %c0_34] : memref<3x1x128xf32, #tpu.memory_space<vmem>>, vector<1x1x128xf32>
    %54 = vector.shape_cast %53 : vector<1x1x128xf32> to vector<1x128xf32>
    %55 = vector.broadcast %54 : vector<1x128xf32> to vector<8x128xf32>
    %56 = arith.addf %52, %55 : vector<8x128xf32>
    %cst_35 = arith.constant 0.000000e+00 : f32
    %57 = vector.broadcast %cst_35 : f32 to vector<8x128xf32>
    %58 = arith.cmpf ogt, %56, %57 : vector<8x128xf32>
    %cst_36 = arith.constant 0.00999999977 : f32
    %59 = vector.broadcast %cst_36 : f32 to vector<8x128xf32>
    %60 = arith.mulf %59, %56 : vector<8x128xf32>
    %61 = arith.select %58, %56, %60 : vector<8x128xi1>, vector<8x128xf32>
    %62 = arith.mulf %61, %3 : vector<8x128xf32>
    %63 = arith.truncf %62 : vector<8x128xf32> to vector<8x128xbf16>
    %c2 = arith.constant 2 : index
    %c0_37 = arith.constant 0 : index
    %c0_38 = arith.constant 0 : index
    %64 = vector.load %arg3[%c2, %c0_37, %c0_38] : memref<3x128x128xbf16, #tpu.memory_space<vmem>>, vector<1x128x128xbf16>
    %65 = vector.shape_cast %64 : vector<1x128x128xbf16> to vector<128x128xbf16>
    %cst_39 = arith.constant dense<0.000000e+00> : vector<8x128xf32>
    %66 = tpu.matmul %63, %65, %cst_39 {dimension_numbers = #tpu.dot_dimension_numbers<[1], [0], [0], [1], [0, 0, 1, 1], [], []>} : vector<8x128xbf16>, vector<128x128xbf16>, vector<8x128xf32> -> vector<8x128xf32>
    %c2_40 = arith.constant 2 : index
    %c0_41 = arith.constant 0 : index
    %c0_42 = arith.constant 0 : index
    %67 = vector.load %arg4[%c2_40, %c0_41, %c0_42] : memref<3x1x128xf32, #tpu.memory_space<vmem>>, vector<1x1x128xf32>
    %68 = vector.shape_cast %67 : vector<1x1x128xf32> to vector<1x128xf32>
    %69 = vector.broadcast %68 : vector<1x128xf32> to vector<8x128xf32>
    %70 = arith.addf %66, %69 : vector<8x128xf32>
    %cst_43 = arith.constant 0.000000e+00 : f32
    %71 = vector.broadcast %cst_43 : f32 to vector<8x128xf32>
    %72 = arith.cmpf ogt, %70, %71 : vector<8x128xf32>
    %cst_44 = arith.constant 0.00999999977 : f32
    %73 = vector.broadcast %cst_44 : f32 to vector<8x128xf32>
    %74 = arith.mulf %73, %70 : vector<8x128xf32>
    %75 = arith.select %72, %70, %74 : vector<8x128xi1>, vector<8x128xf32>
    %76 = arith.mulf %75, %5 : vector<8x128xf32>
    %77 = arith.truncf %76 : vector<8x128xf32> to vector<8x128xbf16>
    %c2_45 = arith.constant 2 : index
    %c0_46 = arith.constant 0 : index
    %c0_47 = arith.constant 0 : index
    %78 = vector.load %arg5[%c2_45, %c0_46, %c0_47] : memref<3x128x128xbf16, #tpu.memory_space<vmem>>, vector<1x128x128xbf16>
    %79 = vector.shape_cast %78 : vector<1x128x128xbf16> to vector<128x128xbf16>
    %cst_48 = arith.constant dense<0.000000e+00> : vector<8x128xf32>
    %80 = tpu.matmul %77, %79, %cst_48 {dimension_numbers = #tpu.dot_dimension_numbers<[1], [0], [0], [1], [0, 0, 1, 1], [], []>} : vector<8x128xbf16>, vector<128x128xbf16>, vector<8x128xf32> -> vector<8x128xf32>
    %c2_49 = arith.constant 2 : index
    %c0_50 = arith.constant 0 : index
    %c0_51 = arith.constant 0 : index
    %81 = vector.load %arg6[%c2_49, %c0_50, %c0_51] : memref<3x1x128xf32, #tpu.memory_space<vmem>>, vector<1x1x128xf32>
    %82 = vector.shape_cast %81 : vector<1x1x128xf32> to vector<1x128xf32>
    %83 = vector.broadcast %82 : vector<1x128xf32> to vector<8x128xf32>
    %84 = arith.addf %80, %83 : vector<8x128xf32>
    %cst_52 = arith.constant 0.000000e+00 : f32
    %85 = vector.broadcast %cst_52 : f32 to vector<8x128xf32>
    %86 = arith.cmpf ogt, %84, %85 : vector<8x128xf32>
    %cst_53 = arith.constant 0.00999999977 : f32
    %87 = vector.broadcast %cst_53 : f32 to vector<8x128xf32>
    %88 = arith.mulf %87, %84 : vector<8x128xf32>
    %89 = arith.select %86, %84, %88 : vector<8x128xi1>, vector<8x128xf32>
    %90 = arith.mulf %89, %3 : vector<8x128xf32>
    %c0_54 = arith.constant 0 : index
    %c0_55 = arith.constant 0 : index
    %91 = vector.load %arg7[%c0_54, %c0_55] : memref<8x128xf32, #tpu.memory_space<vmem>>, vector<8x128xf32>
    tpu.vector_store %arg7[%c0_54, %c0_55], %90 {strides = array<i32>} : memref<8x128xf32, #tpu.memory_space<vmem>>, vector<8x128xf32>,
    return
  }
  func.func @transform_0(%arg0: i32) -> (i32, i32) {
    %c0_i32 = arith.constant 0 : i32
    %c0_i32_0 = arith.constant 0 : i32
    return %arg0, %c0_i32 : i32, i32
  }
  func.func @transform_1(%arg0: i32) -> (i32, i32) {
    %c0_i32 = arith.constant 0 : i32
    %c0_i32_0 = arith.constant 0 : i32
    return %arg0, %c0_i32 : i32, i32
  }
  func.func @transform_2(%arg0: i32) -> (i32, i32, i32) {
    %c0_i32 = arith.constant 0 : i32
    %c0_i32_0 = arith.constant 0 : i32
    %c0_i32_1 = arith.constant 0 : i32
    %c0_i32_2 = arith.constant 0 : i32
    return %c0_i32, %c0_i32_0, %c0_i32_1 : i32, i32, i32
  }
  func.func @transform_3(%arg0: i32) -> (i32, i32, i32) {
    %c0_i32 = arith.constant 0 : i32
    %c0_i32_0 = arith.constant 0 : i32
    %c0_i32_1 = arith.constant 0 : i32
    %c0_i32_2 = arith.constant 0 : i32
    return %c0_i32, %c0_i32_0, %c0_i32_1 : i32, i32, i32
  }
  func.func @transform_4(%arg0: i32) -> (i32, i32, i32) {
    %c0_i32 = arith.constant 0 : i32
    %c0_i32_0 = arith.constant 0 : i32
    %c0_i32_1 = arith.constant 0 : i32
    %c0_i32_2 = arith.constant 0 : i32
    return %c0_i32, %c0_i32_0, %c0_i32_1 : i32, i32, i32
  }
  func.func @transform_5(%arg0: i32) -> (i32, i32, i32) {
    %c0_i32 = arith.constant 0 : i32
    %c0_i32_0 = arith.constant 0 : i32
    %c0_i32_1 = arith.constant 0 : i32
    %c0_i32_2 = arith.constant 0 : i32
    return %c0_i32, %c0_i32_0, %c0_i32_1 : i32, i32, i32
  }
  func.func @transform_6(%arg0: i32) -> (i32, i32) {
    %c0_i32 = arith.constant 0 : i32
    %c0_i32_0 = arith.constant 0 : i32
    return %arg0, %c0_i32 : i32, i32
  }
}

</mosaic_0001>

<bundles_post_ra>
// kernel: tpu_custom_call.1
= control target key start
LH: loop header
LB: loop body
LE: loop exit
PB: predicated region body
PF: predicated region fallthrough
CT: control target
= control target key end

     0   :  { %s1662_s0 = inlined_call_operand.vmem [shape: f32[16,128], index: 0, kind: input, shape index: {}]   ;;  %s1663_s1 = inlined_call_operand.vmem [shape: f32[16,1], index: 1, kind: input, shape index: {}]   ;;  %s1664_s2 = inlined_call_operand.hbm [shape: bf16[3,128,128], index: 2, kind: input, shape index: {}]   ;;  %s1665_s3 = inlined_call_operand.vmem [shape: f32[3,1,128], index: 3, kind: input, shape index: {}]   ;;  %s1666_s4 = inlined_call_operand.hbm [shape: bf16[3,128,128], index: 4, kind: input, shape index: {}]   ;;  %s1667_s5 = inlined_call_operand.hbm [shape: f32[3,1,128], index: 5, kind: input, shape index: {}]   ;;  %s1668_s6 = inlined_call_operand.hbm [shape: f32[16,128], index: 6, kind: output, shape index: {}]  }
   0x1   :  { %1669 = sst [smem:[#allocation12_spill]] %s1664_s2 }
   0x2   :  { %11 = vsyncpa [#allocation3], 0 }
   0x3   :  { %12 = vsyncpa [#allocation6], 0 }
   0x4   :  { %13 = vsyncpa [#allocation4], 0 }
   0x5   :  { %15 = vsyncpa [#allocation4 + $0x1], 0  ;;  %s1511_s21 = smov 0   ;;  %s1513_s22 = smov 0  }
   0x6   :  { %s1515_s23 = smov 0   ;;  %s1517_s24 = smov 0  }
   0x7 LB: > { %s1532_s25 = sadd.s32 4294967295, %s1466_s24   ;;  %s965_s26 = sadd.s32 4294967294, %s1466_s24   ;;  %s1466_s24 = sphi %s1517_s24, %s1678_s24   ;;  %s1462_s23 = sphi %s1515_s23, %s1677_s23   ;;  %s1458_s22 = sphi %s1513_s22, %s1676_s22   ;;  %s1454_s21 = sphi %s1511_s21, %s1675_s21  }
   0x8   : > { %s1536_s27 = sadd.s32 1, %s1466_s24   ;;  %s164_s28 = sadd.s32 1, %s1462_s23 }
   0x9   : > { %s161_s29 = ssub.s32 %s1466_s24, %s1536_s27  ;;  %p174_p0 = scmp.ne.s32.totalorder %s1462_s23, %s1458_s22 }
   0xa   : > { %p162_p1 = scmp.eq.s32.totalorder %s161_s29, 0  ;;  %p175_p2 = scmp.eq.s32.totalorder %s1532_s25, 1 }
   0xb   : > { %p180_p3 = scmp.ne.s32.totalorder %s1458_s22, %s1454_s21  ;;  %p181_p4 = scmp.eq.s32.totalorder %s965_s26, 1 }
   0xc   : > { %s1547_s30 = scalar_select %p162_p1, %s1462_s23, %s164_s28  }
   0xd   : > { %p1549_p5 = por %p175_p2, %p174_p0  ;;  %p1553_p6 = por %p181_p4, %p180_p3 }
   0xe   : > { %p966_p7 = scmp.ge.s32.totalorder %s1466_s24, 1  ;;  %p188_p8 = scmp.lt.s32.totalorder %s1466_s24, 3 }
   0xf   : > { %p1252_p9 = scmp.eq.s32.totalorder %s1532_s25, 0  ;;  %s216_s12 = sshll.u32 %s1666_s4, 4  ;;  %s217_s12 = int_to_ptr.hbm [resolvable:$true] %s216_s12 }
  0x10   : > { %p1560_p10 = pnand %p966_p7, %p188_p8  ;;  %s1673_s2 = sld [smem:[#allocation12_spill]] }
  0x11   : > { %s1468_s17 = smov [#allocation5]   ;;  %s1469_s19 = smov 64  }
  0x12   : > { %p1238_p11 = pneg %p1560_p10  ;;  %s218_s18 = sshll.u32 %s1468_s17, 4  ;;  %s219_s18 = int_to_ptr.vmem [resolvable:$true] %s218_s18 }
  0x13   : > { %s1470_s20 = smov 4   ;;  %s1471_s26 = smov [#allocation2]  }
  0x14   : > { %p1574_p12 = pnand %p1252_p9, %p1238_p11  ;;  %s201_s28 = sshll.u32 %s1471_s26, 4  ;;  %s202_s28 = int_to_ptr.vmem [resolvable:$true] %s201_s28 }
  0x15   : > { %s230_s11 = sshll.u32 %s1667_s5, 4  ;;  %s1472_s13 = smov [#allocation7]   ;;  %s231_s11 = int_to_ptr.hbm [resolvable:$true] %s230_s11 }
  0x16   : > { %s199_s15 = sshll.u32 %s1673_s2, 4  ;;  %s232_s14 = sshll.u32 %s1472_s13, 4  ;;  %s200_s15 = int_to_ptr.hbm [resolvable:$true] %s199_s15  ;;  %s233_s14 = int_to_ptr.vmem [resolvable:$true] %s232_s14 }
  0x17   : > { %1244 = dma.hbm_to_vmem [thread:$0]  (!%p1574_p12), %s217_s12, 3072, %s219_s18, [#allocation6], %s1469_s19, %s1469_s19, %s1470_s20  }
  0x18   : > { %1241 = dma.hbm_to_vmem [thread:$0]  (!%p1574_p12), %s200_s15, 3072, %s202_s28, [#allocation3], %s1469_s19, %s1469_s19, %s1470_s20  }
  0x19   : > { %s1473_s17 = smov 16   ;;  %s1474_s2 = smov 1  }
  0x1a   : > { %1247 = dma.hbm_to_vmem [thread:$0]  (!%p1574_p12), %s231_s11, 48, %s233_s14, [#allocation6], %s1473_s17, %s1473_s17, %s1474_s2  }
  0x1b   : > { %262 = sbr.rel (%p1560_p10) target bundleno = 984 (0x3d8), region = 44 }
  0x20   : > { %1441 = dma.done.wait (%p1252_p9), [#allocation3], 3072  }
  0x21   : > { %1443 = vsyncadd (%p1252_p9), [#allocation3], 4294964224 }
  0x22   : > { %1445 = dma.done.wait (%p1252_p9), [#allocation6], 3120  }
  0x23   : > { %1447 = vsyncadd (%p1252_p9), [#allocation6], 4294964176  ;;  %p306_p13 = scmp.lt.s32.totalorder %s1532_s25, 1  ;;  %v1475_v0 = vmov 0   ;;  %v1183_v2 = vld [vmem:[#allocation2 + $0x38] sm:$0xff]  ;;  %v1182_v3 = vld [vmem:[#allocation2 + $0x30] sm:$0xff] }
  0x24   : > { %1299 = vset.pattern.permute.xlu0 %v1475_v0  ;;  %391 = vmatpush.bf16.msra.mxu0 %v1183_v2  ;;  %v1181_v4 = vld [vmem:[#allocation2 + $0x28] sm:$0xff]  ;;  %v1180_v5 = vld [vmem:[#allocation2 + $0x20] sm:$0xff]  ;;  %v1179_v6 = vld [vmem:[#allocation2 + $0x18] sm:$0xff]  ;;  %s303_s14 = sand.u32 1, %s1458_s22   ;;  %s1416_s10 = scalar_lea.hbm %s1668_s6, 16 }
  0x25   : > { %s1599_s2 = scalar_select %p306_p13, %s1532_s25, 1  ;;  %v1178_v7 = vld [vmem:[#allocation2 + $0x10] sm:$0xff]  ;;  %v1177_v8 = vld [vmem:[#allocation2 + $0x8] sm:$0xff]  ;;  %v1176_v9 = vld [vmem:[#allocation2] sm:$0xff] }
  0x26   : > { %v1191_v10 = vld [vmem:[#allocation5 + $0x38] sm:$0xff]  ;;  %v1190_v11 = vld [vmem:[#allocation5 + $0x30] sm:$0xff]  ;;  %v1189_v12 = vld [vmem:[#allocation5 + $0x28] sm:$0xff]  ;;  %s975_s17 = sshll.u32 %s303_s14, 3 }
  0x27   : > { %s976_s9 = sshll.u32 %s1599_s2, 3  ;;  %477 = vmatpush.bf16.msra.mxu1 %v1191_v10  ;;  %v1188_v13 = vld [vmem:[#allocation5 + $0x20] sm:$0xff]  ;;  %v1187_v14 = vld [vmem:[#allocation5 + $0x18] sm:$0xff]  ;;  %v1186_v15 = vld [vmem:[#allocation5 + $0x10] sm:$0xff]  ;;  %s1173_s2 = sshll.u32 %s1532_s25, 3 }
  0x28   : > { %s313_s16 = scalar_lea.vmem %s1663_s1, %s976_s9  ;;  %392 = vmatpush.bf16.msra.mxu0 %v1182_v3  ;;  %s309_s20 = scalar_lea.vmem %s1662_s0, %s976_s9  ;;  %v1185_v20 = vld [vmem:[#allocation5 + $0x8] sm:$0xff]  ;;  %v1184_v21 = vld [vmem:[#allocation5] sm:$0xff]  ;;  %v1199_v22 = vld [vmem:[#allocation2 + $0x78] sm:$0xff] }
  0x29   : > { %v315_v1 = vld [vmem:[%s313_s16] sm:$0xff]  ;;  %565 = vmatpush.bf16.msra.mxu2 %v1199_v22  ;;  %v1198_v23 = vld [vmem:[#allocation2 + $0x70] sm:$0xff]  ;;  %v1197_v24 = vld [vmem:[#allocation2 + $0x68] sm:$0xff]  ;;  %s858_s15 = scalar_lea.hbm %s1668_s6, %s1173_s2  ;;  %s305_s16 = scalar_lea.vmem [#allocation8], %s975_s17 }
  0x2a   : > { %318 = vperm.xlu0 %1299, %v315_v1   ;;  %v314_v16 = vld [vmem:[%s309_s20] sm:$0xff]  ;;  %v1195_v26 = vld [vmem:[#allocation2 + $0x58] sm:$0xff]  ;;  %v1194_v27 = vld [vmem:[#allocation2 + $0x50] sm:$0xff]  ;;  %s860_s18 = sshll.u32 %s305_s16, 4  ;;  %s862_s19 = sshll.u32 %s858_s15, 4  ;;  %s861_s18 = int_to_ptr.vmem [resolvable:$true] %s860_s18  ;;  %s863_s19 = int_to_ptr.hbm [resolvable:$true] %s862_s19 }
  0x2b   : > { %478 = vmatpush.bf16.msra.mxu1 %v1190_v11  ;;  %v1196_v25 = vld [vmem:[#allocation2 + $0x60] sm:$0xff]  ;;  %v1193_v36 = vld [vmem:[#allocation2 + $0x48] sm:$0xff]  ;;  %v1207_v38 = vld [vmem:[#allocation5 + $0x78] sm:$0xff]  ;;  %s848_s25 = scalar_lea.sflag [#allocation4], %s303_s14  ;;  %s1410_s20 = sshra.s32 %s863_s19, 4  ;;  %s1411_s20 = int_to_ptr.hbm [resolvable:$true] %s1410_s20 }
  0x2c   : > { %393 = vmatpush.bf16.msra.mxu0 %v1181_v4  ;;  %v1300_v28 = vld [vmem:[%s1665_s3] ss:$0 sm:$0xff]  ;;  %653 = vmatpush.bf16.msra.mxu3 %v1207_v38  ;;  %v1206_v39 = vld [vmem:[#allocation5 + $0x70] sm:$0xff]  ;;  %v1205_v40 = vld [vmem:[#allocation5 + $0x68] sm:$0xff]  ;;  %s1412_s26 = scalar_lea.hbm %s1411_s20, 8  ;;  %p1417_p3 = scmp.lt.s32.totalorder %s1411_s20, %s1668_s6 }
  0x2d   : > { %566 = vmatpush.bf16.msra.mxu2 %v1198_v23  ;;  %v1192_v37 = vld [vmem:[#allocation2 + $0x40] sm:$0xff]  ;;  %v1203_v42 = vld [vmem:[#allocation5 + $0x58] sm:$0xff]  ;;  %v1202_v43 = vld [vmem:[#allocation5 + $0x50] sm:$0xff]  ;;  %p1413_p0 = scmp.ne.s32.totalorder %s1411_s20, %s1412_s26  ;;  %p1418_p4 = scmp.lt.s32.totalorder %s1416_s10, %s1412_s26 }
  0x2e   : > { %v1204_v41 = vld [vmem:[#allocation5 + $0x60] sm:$0xff]  ;;  %v1201_v52 = vld [vmem:[#allocation5 + $0x48] sm:$0xff]  ;;  %v1215_v54 = vld [vmem:[#allocation2 + $0xb8] sm:$0xff] }
  0x2f   : > { %479 = vmatpush.bf16.msra.mxu1 %v1189_v12  ;;  %v1301_v44 = vld [vmem:[#allocation7] ss:$0 sm:$0xff]  ;;  %v1214_v55 = vld [vmem:[#allocation2 + $0xb0] sm:$0xff]  ;;  %v1213_v56 = vld [vmem:[#allocation2 + $0xa8] sm:$0xff]  ;;  %p1414_p1 = pnand %p1413_p0, %p1549_p5  ;;  %p1419_p7 = por %p1418_p4, %p1417_p3 }
  0x30   : > { %394 = vmatpush.bf16.msra.mxu0 %v1180_v5  ;;  %654 = vmatpush.bf16.msra.mxu3 %v1206_v39  ;;  %v1200_v53 = vld [vmem:[#allocation5 + $0x40] sm:$0xff]  ;;  %v1211_v58 = vld [vmem:[#allocation2 + $0x98] sm:$0xff]  ;;  %v1210_v59 = vld [vmem:[#allocation2 + $0x90] sm:$0xff] }
  0x31   : > { %567 = vmatpush.bf16.msra.mxu2 %v1197_v24  ;;  %v1212_v57 = vld [vmem:[#allocation2 + $0xa0] sm:$0xff]  ;;  %v1209_v4 = vld [vmem:[#allocation2 + $0x88] sm:$0xff]  ;;  %v1219_v10 = vld [vmem:[#allocation5 + $0x98] sm:$0xff]  ;;  %p1415_p2 = pneg %p1414_p1 }
  0x32   : > { %v1302_v60 = vld [vmem:[%s1665_s3 + $0x1] ss:$0 sm:$0xff]  ;;  %v1218_v11 = vld [vmem:[#allocation5 + $0x90] sm:$0xff]  ;;  %v1304_v23 = vld [vmem:[%s1665_s3 + $0x2] ss:$0 sm:$0xff] }
  0x33   : > { %480 = vmatpush.bf16.msra.mxu1 %v1188_v13  ;;  %v1208_v5 = vld [vmem:[#allocation2 + $0x80] sm:$0xff]  ;;  %p1420_p8 = pnand %p1419_p7, %p1415_p2 }
  0x34   : > { %395 = vmatpush.bf16.msra.mxu0 %v1179_v6  ;;  %655 = vmatpush.bf16.msra.mxu3 %v1205_v40  ;;  %v1223_v6 = vld [vmem:[#allocation5 + $0xb8] sm:$0xff]  ;;  %v1303_v12 = vld [vmem:[#allocation7 + $0x1] ss:$0 sm:$0xff] }
  0x35   : > { %568 = vmatpush.bf16.msra.mxu2 %v1196_v25  ;;  %v1216_v22 = vld [vmem:[#allocation5 + $0x80] sm:$0xff] }
  0x37   : > { %481 = vmatpush.bf16.msra.mxu1 %v1187_v14 }
  0x38   : > { %396 = vmatpush.bf16.msra.mxu0 %v1178_v7  ;;  %656 = vmatpush.bf16.msra.mxu3 %v1204_v41  ;;  %v1222_v7 = vld [vmem:[#allocation5 + $0xb0] sm:$0xff] }
  0x39   : > { %569 = vmatpush.bf16.msra.mxu2 %v1195_v26 }
  0x3b   : > { %482 = vmatpush.bf16.msra.mxu1 %v1186_v15 }
  0x3c   : > { %397 = vmatpush.bf16.msra.mxu0 %v1177_v8  ;;  %657 = vmatpush.bf16.msra.mxu3 %v1203_v42  ;;  %v1221_v8 = vld [vmem:[#allocation5 + $0xa8] sm:$0xff] }
  0x3d   : > { %570 = vmatpush.bf16.msra.mxu2 %v1194_v27 }
  0x3f   : > { %483 = vmatpush.bf16.msra.mxu1 %v1185_v20 }
  0x40   : > { %398 = vmatpush.bf16.msra.mxu0 %v1176_v9  ;;  %658 = vmatpush.bf16.msra.mxu3 %v1202_v43  ;;  %v1220_v9 = vld [vmem:[#allocation5 + $0xa0] sm:$0xff] }
  0x41   : > { %571 = vmatpush.bf16.msra.mxu2 %v1193_v36 }
  0x43   : > { %484 = vmatpush.bf16.msra.mxu1 %v1184_v21  ;;  %v1217_v21 = vld [vmem:[#allocation5 + $0x88] sm:$0xff] }
  0x44   : > { %659 = vmatpush.bf16.msra.mxu3 %v1201_v52  ;;  %741 = vmatpush.bf16.msrb.mxu0 %v1215_v54 }
  0x45   : > { %572 = vmatpush.bf16.msra.mxu2 %v1192_v37 }
  0x47   : > { %829 = vmatpush.bf16.msrb.mxu1 %v1223_v6 }
  0x48   : > { %660 = vmatpush.bf16.msra.mxu3 %v1200_v53  ;;  %742 = vmatpush.bf16.msrb.mxu0 %v1214_v55 }
  0x4b   : > { %830 = vmatpush.bf16.msrb.mxu1 %v1222_v7 }
  0x4c   : > { %743 = vmatpush.bf16.msrb.mxu0 %v1213_v56 }
  0x4f   : > { %831 = vmatpush.bf16.msrb.mxu1 %v1221_v8 }
  0x50   : > { %744 = vmatpush.bf16.msrb.mxu0 %v1212_v57 }
  0x53   : > { %832 = vmatpush.bf16.msrb.mxu1 %v1220_v9 }
  0x54   : > { %745 = vmatpush.bf16.msrb.mxu0 %v1211_v58 }
  0x57   : > { %833 = vmatpush.bf16.msrb.mxu1 %v1219_v10 }
  0x58   : > { %746 = vmatpush.bf16.msrb.mxu0 %v1210_v59 }
  0x5b   : > { %834 = vmatpush.bf16.msrb.mxu1 %v1218_v11 }
  0x5c   : > { %747 = vmatpush.bf16.msrb.mxu0 %v1209_v4 }
  0x5f   : > { %835 = vmatpush.bf16.msrb.mxu1 %v1217_v21 }
  0x60   : > { %748 = vmatpush.bf16.msrb.mxu0 %v1208_v5 }
  0x63   : > { %836 = vmatpush.bf16.msrb.mxu1 %v1216_v22 }
  0x9c   : > { %v1612_v17 = vpop.permute.xlu0 %318 }
  0x9d   : > { %v321_v18 = vmul.f32 %v1612_v17, %v314_v16 }
  0x9f   : > { %v322_v19 = vpack.c.bf16 %v321_v18, %v321_v18 }
  0xa1   : > { %399 = vmatmul.bf16.vlgmr.msra.gmra.mxu0 %v322_v19 }
 0x11e   : > { %v400_v29 = vpop.f32.mrf.mxu0 }
 0x11f   : > { %v401_v30 = vadd.f32 %v1300_v28, %v400_v29 }
 0x121   : > { %vm404_vm0 = vcmp.gt.f32.partialorder %v401_v30, 0.0  ;;  %v405_v31 = vmul.f32 0.01, %v401_v30 }
 0x123   : > { %v406_v32 = vsel %vm404_vm0, %v401_v30, %v405_v31  ;;  %v1305_v31 = vld [vmem:[#allocation7 + $0x2] ss:$0 sm:$0xff] }
 0x124   : > { %v407_v33 = vmul.f32 %v406_v32, %v1612_v17 }
 0x126   : > { %v402_v34 = vpop.f32.mrf.mxu0  ;;  %v408_v35 = vpack.c.bf16 %v407_v33, %v407_v33 }
 0x128   : > { %485 = vmatmul.bf16.vlgmr.msra.gmra.mxu1 %v408_v35 }
 0x1a5   : > { %v486_v45 = vpop.f32.mrf.mxu1 }
 0x1a6   : > { %v487_v46 = vadd.f32 %v1301_v44, %v486_v45 }
 0x1a8   : > { %vm490_vm1 = vcmp.gt.f32.partialorder %v487_v46, 0.0  ;;  %v491_v47 = vmul.f32 0.01, %v487_v46 }
 0x1aa   : > { %v492_v48 = vsel %vm490_vm1, %v487_v46, %v491_v47 }
 0x1ab   : > { %v493_v49 = vmul.f32 %v492_v48, %v1612_v17 }
 0x1ad   : > { %v488_v50 = vpop.f32.mrf.mxu1  ;;  %v494_v51 = vpack.c.bf16 %v493_v49, %v493_v49 }
 0x1af   : > { %573 = vmatmul.bf16.vlgmr.msra.gmra.mxu2 %v494_v51 }
 0x232   : > { %v574_v61 = vpop.f32.mrf.mxu2 }
 0x233   : > { %v575_v62 = vadd.f32 %v1302_v60, %v574_v61 }
 0x235   : > { %vm578_vm2 = vcmp.gt.f32.partialorder %v575_v62, 0.0  ;;  %v579_v63 = vmul.f32 0.01, %v575_v62 }
 0x237   : > { %v580_v0 = vsel %vm578_vm2, %v575_v62, %v579_v63 }
 0x238   : > { %v581_v1 = vmul.f32 %v580_v0, %v1612_v17 }
 0x23a   : > { %v576_v2 = vpop.f32.mrf.mxu2  ;;  %v582_v3 = vpack.c.bf16 %v581_v1, %v581_v1 }
 0x23c   : > { %661 = vmatmul.bf16.vlgmr.msra.gmra.mxu3 %v582_v3 }
 0x2bf   : > { %v662_v13 = vpop.f32.mrf.mxu3 }
 0x2c0   : > { %v663_v14 = vadd.f32 %v1303_v12, %v662_v13 }
 0x2c2   : > { %vm666_vm3 = vcmp.gt.f32.partialorder %v663_v14, 0.0  ;;  %v667_v15 = vmul.f32 0.01, %v663_v14 }
 0x2c4   : > { %v668_v16 = vsel %vm666_vm3, %v663_v14, %v667_v15 }
 0x2c5   : > { %v669_v18 = vmul.f32 %v668_v16, %v1612_v17 }
 0x2c7   : > { %v664_v19 = vpop.f32.mrf.mxu3  ;;  %v670_v20 = vpack.c.bf16 %v669_v18, %v669_v18 }
 0x2c9   : > { %749 = vmatmul.bf16.vlgmr.msrb.gmra.mxu0 %v670_v20 }
 0x346   : > { %v750_v24 = vpop.f32.mrf.mxu0 }
 0x347   : > { %v751_v25 = vadd.f32 %v1304_v23, %v750_v24 }
 0x349   : > { %vm754_vm4 = vcmp.gt.f32.partialorder %v751_v25, 0.0  ;;  %v755_v26 = vmul.f32 0.01, %v751_v25 }
 0x34b   : > { %v756_v27 = vsel %vm754_vm4, %v751_v25, %v755_v26 }
 0x34c   : > { %v757_v28 = vmul.f32 %v756_v27, %v1612_v17 }
 0x34e   : > { %v752_v29 = vpop.f32.mrf.mxu0  ;;  %v758_v30 = vpack.c.bf16 %v757_v28, %v757_v28 }
 0x350   : > { %837 = vmatmul.bf16.vlgmr.msrb.gmra.mxu1 %v758_v30 }
 0x3cd   : > { %v838_v32 = vpop.f32.mrf.mxu1 }
 0x3ce   : > { %v839_v33 = vadd.f32 %v1305_v31, %v838_v32 }
 0x3d0   : > { %vm842_vm5 = vcmp.gt.f32.partialorder %v839_v33, 0.0  ;;  %v843_v34 = vmul.f32 0.01, %v839_v33 }
 0x3d2   : > { %v844_v35 = vsel %vm842_vm5, %v839_v33, %v843_v34 }
 0x3d3   : > { %v845_v36 = vmul.f32 %v844_v35, %v1612_v17 }
 0x3d5   : > { %v840_v37 = vpop.f32.mrf.mxu1  ;;  %846 = vst [vmem:[%s305_s16] sm:$0xff] %v845_v36 }
 0x3d6   : > { %1423 = shalt.err (!%p1420_p8)
}
 0x3d7   : > { %1236 = dma.vmem_to_hbm [thread:$0]  (%p1549_p5), %s861_s18, 128, %s863_s19, %s848_s25  }
 0x3d8 PF: > { %p1258_p9 = scmp.ge.s32.totalorder %s1466_s24, 2  ;;  %s874_s14 = sand.u32 1, %s1454_s21  }
 0x3d9   : > { %s875_s17 = scalar_lea.sflag [#allocation4], %s874_s14 }
 0x3da   : > { %p1249_p10 = pnand %p1258_p9, %p1553_p6 }
 0x3dc   : > { %p1250_p11 = pneg %p1249_p10 }
 0x3de   : > { %1449 = dma.done.wait (%p1250_p11), %s875_s17, 128  }
 0x3df   : > { %1451 = vsyncadd (%p1250_p11), %s875_s17, 4294967168  ;;  %p18_p12 = scmp.ge.s32.totalorder %s1536_s27, 4   ;;  %s1675_s21 = smov %s1458_s22 }
 0x3e0   : > { %s1676_s22 = smov %s1462_s23  ;;  %s1677_s23 = smov %s1547_s30 }
 0x3e1   : > { %s1678_s24 = smov %s1536_s27  ;;  %20 = sbr.rel (!%p18_p12) target bundleno = 7 (0x7), region = 103 }
 0x3e6   :  { %881 = vsyncpa [#allocation3], 1 }
 0x3e7   :  { %883 = vsyncpa [#allocation3 + $0x1], 1 }
 0x3e8   :  { %884 = vsyncpa [#allocation6], 1 }
 0x3e9   :  { %885 = vsyncpa [#allocation4], 1 }
 0x3ea   :  { %887 = vsyncpa [#allocation4 + $0x1], 1 }

// kernel: tpu_custom_call.1
= control target key start
LH: loop header
LB: loop body
LE: loop exit
PB: predicated region body
PF: predicated region fallthrough
CT: control target
= control target key end

     0   :  { %s1662_s0 = inlined_call_operand.vmem [shape: f32[16,128], index: 0, kind: input, shape index: {}]   ;;  %s1663_s1 = inlined_call_operand.vmem [shape: f32[16,1], index: 1, kind: input, shape index: {}]   ;;  %s1664_s2 = inlined_call_operand.hbm [shape: bf16[3,128,128], index: 2, kind: input, shape index: {}]   ;;  %s1665_s3 = inlined_call_operand.vmem [shape: f32[3,1,128], index: 3, kind: input, shape index: {}]   ;;  %s1666_s4 = inlined_call_operand.hbm [shape: bf16[3,128,128], index: 4, kind: input, shape index: {}]   ;;  %s1667_s5 = inlined_call_operand.hbm [shape: f32[3,1,128], index: 5, kind: input, shape index: {}]   ;;  %s1668_s6 = inlined_call_operand.hbm [shape: f32[16,128], index: 6, kind: output, shape index: {}]  }
   0x1   :  { %1669 = sst [smem:[#allocation12_spill]] %s1664_s2 }
   0x2   :  { %11 = vsyncpa [#allocation3], 0 }
   0x3   :  { %12 = vsyncpa [#allocation6], 0 }
   0x4   :  { %13 = vsyncpa [#allocation4], 0 }
   0x5   :  { %15 = vsyncpa [#allocation4 + $0x1], 0  ;;  %s1511_s21 = smov 0   ;;  %s1513_s22 = smov 0  }
   0x6   :  { %s1515_s23 = smov 0   ;;  %s1517_s24 = smov 0  }
   0x7 LB: > { %s1532_s25 = sadd.s32 4294967295, %s1466_s24   ;;  %s965_s26 = sadd.s32 4294967294, %s1466_s24   ;;  %s1466_s24 = sphi %s1517_s24, %s1678_s24   ;;  %s1462_s23 = sphi %s1515_s23, %s1677_s23   ;;  %s1458_s22 = sphi %s1513_s22, %s1676_s22   ;;  %s1454_s21 = sphi %s1511_s21, %s1675_s21  }
   0x8   : > { %s1536_s27 = sadd.s32 1, %s1466_s24   ;;  %s164_s28 = sadd.s32 1, %s1462_s23 }
   0x9   : > { %s161_s29 = ssub.s32 %s1466_s24, %s1536_s27  ;;  %p174_p0 = scmp.ne.s32.totalorder %s1462_s23, %s1458_s22 }
   0xa   : > { %p162_p1 = scmp.eq.s32.totalorder %s161_s29, 0  ;;  %p175_p2 = scmp.eq.s32.totalorder %s1532_s25, 1 }
   0xb   : > { %p180_p3 = scmp.ne.s32.totalorder %s1458_s22, %s1454_s21  ;;  %p181_p4 = scmp.eq.s32.totalorder %s965_s26, 1 }
   0xc   : > { %s1547_s30 = scalar_select %p162_p1, %s1462_s23, %s164_s28  }
   0xd   : > { %p1549_p5 = por %p175_p2, %p174_p0  ;;  %p1553_p6 = por %p181_p4, %p180_p3 }
   0xe   : > { %p966_p7 = scmp.ge.s32.totalorder %s1466_s24, 1  ;;  %p188_p8 = scmp.lt.s32.totalorder %s1466_s24, 3 }
   0xf   : > { %p1252_p9 = scmp.eq.s32.totalorder %s1532_s25, 0  ;;  %s216_s12 = sshll.u32 %s1666_s4, 4  ;;  %s217_s12 = int_to_ptr.hbm [resolvable:$true] %s216_s12 }
  0x10   : > { %p1560_p10 = pnand %p966_p7, %p188_p8  ;;  %s1673_s2 = sld [smem:[#allocation12_spill]] }
  0x11   : > { %s1468_s17 = smov [#allocation5]   ;;  %s1469_s19 = smov 64  }
  0x12   : > { %p1238_p11 = pneg %p1560_p10  ;;  %s218_s18 = sshll.u32 %s1468_s17, 4  ;;  %s219_s18 = int_to_ptr.vmem [resolvable:$true] %s218_s18 }
  0x13   : > { %s1470_s20 = smov 4   ;;  %s1471_s26 = smov [#allocation2]  }
  0x14   : > { %p1574_p12 = pnand %p1252_p9, %p1238_p11  ;;  %s201_s28 = sshll.u32 %s1471_s26, 4  ;;  %s202_s28 = int_to_ptr.vmem [resolvable:$true] %s201_s28 }
  0x15   : > { %s230_s11 = sshll.u32 %s1667_s5, 4  ;;  %s1472_s13 = smov [#allocation7]   ;;  %s231_s11 = int_to_ptr.hbm [resolvable:$true] %s230_s11 }
  0x16   : > { %s199_s15 = sshll.u32 %s1673_s2, 4  ;;  %s232_s14 = sshll.u32 %s1472_s13, 4  ;;  %s200_s15 = int_to_ptr.hbm [resolvable:$true] %s199_s15  ;;  %s233_s14 = int_to_ptr.vmem [resolvable:$true] %s232_s14 }
  0x17   : > { %1244 = dma.hbm_to_vmem [thread:$0]  (!%p1574_p12), %s217_s12, 3072, %s219_s18, [#allocation6], %s1469_s19, %s1469_s19, %s1470_s20  }
  0x18   : > { %1241 = dma.hbm_to_vmem [thread:$0]  (!%p1574_p12), %s200_s15, 3072, %s202_s28, [#allocation3], %s1469_s19, %s1469_s19, %s1470_s20  }
  0x19   : > { %s1473_s17 = smov 16   ;;  %s1474_s2 = smov 1  }
  0x1a   : > { %1247 = dma.hbm_to_vmem [thread:$0]  (!%p1574_p12), %s231_s11, 48, %s233_s14, [#allocation6], %s1473_s17, %s1473_s17, %s1474_s2  }
  0x1b   : > { %262 = sbr.rel (%p1560_p10) target bundleno = 984 (0x3d8), region = 44 }
  0x20   : > { %1441 = dma.done.wait (%p1252_p9), [#allocation3], 3072  }
  0x21   : > { %1443 = vsyncadd (%p1252_p9), [#allocation3], 4294964224 }
  0x22   : > { %1445 = dma.done.wait (%p1252_p9), [#allocation6], 3120  }
  0x23   : > { %1447 = vsyncadd (%p1252_p9), [#allocation6], 4294964176  ;;  %p306_p13 = scmp.lt.s32.totalorder %s1532_s25, 1  ;;  %v1475_v0 = vmov 0   ;;  %v1183_v2 = vld [vmem:[#allocation2 + $0x38] sm:$0xff]  ;;  %v1182_v3 = vld [vmem:[#allocation2 + $0x30] sm:$0xff] }
  0x24   : > { %1299 = vset.pattern.permute.xlu0 %v1475_v0  ;;  %391 = vmatpush.bf16.msra.mxu0 %v1183_v2  ;;  %v1181_v4 = vld [vmem:[#allocation2 + $0x28] sm:$0xff]  ;;  %v1180_v5 = vld [vmem:[#allocation2 + $0x20] sm:$0xff]  ;;  %v1179_v6 = vld [vmem:[#allocation2 + $0x18] sm:$0xff]  ;;  %s303_s14 = sand.u32 1, %s1458_s22   ;;  %s1416_s10 = scalar_lea.hbm %s1668_s6, 16 }
  0x25   : > { %s1599_s2 = scalar_select %p306_p13, %s1532_s25, 1  ;;  %v1178_v7 = vld [vmem:[#allocation2 + $0x10] sm:$0xff]  ;;  %v1177_v8 = vld [vmem:[#allocation2 + $0x8] sm:$0xff]  ;;  %v1176_v9 = vld [vmem:[#allocation2] sm:$0xff] }
  0x26   : > { %v1191_v10 = vld [vmem:[#allocation5 + $0x38] sm:$0xff]  ;;  %v1190_v11 = vld [vmem:[#allocation5 + $0x30] sm:$0xff]  ;;  %v1189_v12 = vld [vmem:[#allocation5 + $0x28] sm:$0xff]  ;;  %s975_s17 = sshll.u32 %s303_s14, 3 }
  0x27   : > { %s976_s9 = sshll.u32 %s1599_s2, 3  ;;  %477 = vmatpush.bf16.msra.mxu1 %v1191_v10  ;;  %v1188_v13 = vld [vmem:[#allocation5 + $0x20] sm:$0xff]  ;;  %v1187_v14 = vld [vmem:[#allocation5 + $0x18] sm:$0xff]  ;;  %v1186_v15 = vld [vmem:[#allocation5 + $0x10] sm:$0xff]  ;;  %s1173_s2 = sshll.u32 %s1532_s25, 3 }
  0x28   : > { %s313_s16 = scalar_lea.vmem %s1663_s1, %s976_s9  ;;  %392 = vmatpush.bf16.msra.mxu0 %v1182_v3  ;;  %s309_s20 = scalar_lea.vmem %s1662_s0, %s976_s9  ;;  %v1185_v20 = vld [vmem:[#allocation5 + $0x8] sm:$0xff]  ;;  %v1184_v21 = vld [vmem:[#allocation5] sm:$0xff]  ;;  %v1199_v22 = vld [vmem:[#allocation2 + $0x78] sm:$0xff] }
  0x29   : > { %v315_v1 = vld [vmem:[%s313_s16] sm:$0xff]  ;;  %565 = vmatpush.bf16.msra.mxu2 %v1199_v22  ;;  %v1198_v23 = vld [vmem:[#allocation2 + $0x70] sm:$0xff]  ;;  %v1197_v24 = vld [vmem:[#allocation2 + $0x68] sm:$0xff]  ;;  %s858_s15 = scalar_lea.hbm %s1668_s6, %s1173_s2  ;;  %s305_s16 = scalar_lea.vmem [#allocation8], %s975_s17 }
  0x2a   : > { %318 = vperm.xlu0 %1299, %v315_v1   ;;  %v314_v16 = vld [vmem:[%s309_s20] sm:$0xff]  ;;  %v1195_v26 = vld [vmem:[#allocation2 + $0x58] sm:$0xff]  ;;  %v1194_v27 = vld [vmem:[#allocation2 + $0x50] sm:$0xff]  ;;  %s860_s18 = sshll.u32 %s305_s16, 4  ;;  %s862_s19 = sshll.u32 %s858_s15, 4  ;;  %s861_s18 = int_to_ptr.vmem [resolvable:$true] %s860_s18  ;;  %s863_s19 = int_to_ptr.hbm [resolvable:$true] %s862_s19 }
  0x2b   : > { %478 = vmatpush.bf16.msra.mxu1 %v1190_v11  ;;  %v1196_v25 = vld [vmem:[#allocation2 + $0x60] sm:$0xff]  ;;  %v1193_v36 = vld [vmem:[#allocation2 + $0x48] sm:$0xff]  ;;  %v1207_v38 = vld [vmem:[#allocation5 + $0x78] sm:$0xff]  ;;  %s848_s25 = scalar_lea.sflag [#allocation4], %s303_s14  ;;  %s1410_s20 = sshra.s32 %s863_s19, 4  ;;  %s1411_s20 = int_to_ptr.hbm [resolvable:$true] %s1410_s20 }
  0x2c   : > { %393 = vmatpush.bf16.msra.mxu0 %v1181_v4  ;;  %v1300_v28 = vld [vmem:[%s1665_s3] ss:$0 sm:$0xff]  ;;  %653 = vmatpush.bf16.msra.mxu3 %v1207_v38  ;;  %v1206_v39 = vld [vmem:[#allocation5 + $0x70] sm:$0xff]  ;;  %v1205_v40 = vld [vmem:[#allocation5 + $0x68] sm:$0xff]  ;;  %s1412_s26 = scalar_lea.hbm %s1411_s20, 8  ;;  %p1417_p3 = scmp.lt.s32.totalorder %s1411_s20, %s1668_s6 }
  0x2d   : > { %566 = vmatpush.bf16.msra.mxu2 %v1198_v23  ;;  %v1192_v37 = vld [vmem:[#allocation2 + $0x40] sm:$0xff]  ;;  %v1203_v42 = vld [vmem:[#allocation5 + $0x58] sm:$0xff]  ;;  %v1202_v43 = vld [vmem:[#allocation5 + $0x50] sm:$0xff]  ;;  %p1413_p0 = scmp.ne.s32.totalorder %s1411_s20, %s1412_s26  ;;  %p1418_p4 = scmp.lt.s32.totalorder %s1416_s10, %s1412_s26 }
  0x2e   : > { %v1204_v41 = vld [vmem:[#allocation5 + $0x60] sm:$0xff]  ;;  %v1201_v52 = vld [vmem:[#allocation5 + $0x48] sm:$0xff]  ;;  %v1215_v54 = vld [vmem:[#allocation2 + $0xb8] sm:$0xff] }
  0x2f   : > { %479 = vmatpush.bf16.msra.mxu1 %v1189_v12  ;;  %v1301_v44 = vld [vmem:[#allocation7] ss:$0 sm:$0xff]  ;;  %v1214_v55 = vld [vmem:[#allocation2 + $0xb0] sm:$0xff]  ;;  %v1213_v56 = vld [vmem:[#allocation2 + $0xa8] sm:$0xff]  ;;  %p1414_p1 = pnand %p1413_p0, %p1549_p5  ;;  %p1419_p7 = por %p1418_p4, %p1417_p3 }
  0x30   : > { %394 = vmatpush.bf16.msra.mxu0 %v1180_v5  ;;  %654 = vmatpush.bf16.msra.mxu3 %v1206_v39  ;;  %v1200_v53 = vld [vmem:[#allocation5 + $0x40] sm:$0xff]  ;;  %v1211_v58 = vld [vmem:[#allocation2 + $0x98] sm:$0xff]  ;;  %v1210_v59 = vld [vmem:[#allocation2 + $0x90] sm:$0xff] }
  0x31   : > { %567 = vmatpush.bf16.msra.mxu2 %v1197_v24  ;;  %v1212_v57 = vld [vmem:[#allocation2 + $0xa0] sm:$0xff]  ;;  %v1209_v4 = vld [vmem:[#allocation2 + $0x88] sm:$0xff]  ;;  %v1219_v10 = vld [vmem:[#allocation5 + $0x98] sm:$0xff]  ;;  %p1415_p2 = pneg %p1414_p1 }
  0x32   : > { %v1302_v60 = vld [vmem:[%s1665_s3 + $0x1] ss:$0 sm:$0xff]  ;;  %v1218_v11 = vld [vmem:[#allocation5 + $0x90] sm:$0xff]  ;;  %v1304_v23 = vld [vmem:[%s1665_s3 + $0x2] ss:$0 sm:$0xff] }
  0x33   : > { %480 = vmatpush.bf16.msra.mxu1 %v1188_v13  ;;  %v1208_v5 = vld [vmem:[#allocation2 + $0x80] sm:$0xff]  ;;  %p1420_p8 = pnand %p1419_p7, %p1415_p2 }
  0x34   : > { %395 = vmatpush.bf16.msra.mxu0 %v1179_v6  ;;  %655 = vmatpush.bf16.msra.mxu3 %v1205_v40  ;;  %v1223_v6 = vld [vmem:[#allocation5 + $0xb8] sm:$0xff]  ;;  %v1303_v12 = vld [vmem:[#allocation7 + $0x1] ss:$0 sm:$0xff] }
  0x35   : > { %568 = vmatpush.bf16.msra.mxu2 %v1196_v25  ;;  %v1216_v22 = vld [vmem:[#allocation5 + $0x80] sm:$0xff] }
  0x37   : > { %481 = vmatpush.bf16.msra.mxu1 %v1187_v14 }
  0x38   : > { %396 = vmatpush.bf16.msra.mxu0 %v1178_v7  ;;  %656 = vmatpush.bf16.msra.mxu3 %v1204_v41  ;;  %v1222_v7 = vld [vmem:[#allocation5 + $0xb0] sm:$0xff] }
  0x39   : > { %569 = vmatpush.bf16.msra.mxu2 %v1195_v26 }
  0x3b   : > { %482 = vmatpush.bf16.msra.mxu1 %v1186_v15 }
  0x3c   : > { %397 = vmatpush.bf16.msra.mxu0 %v1177_v8  ;;  %657 = vmatpush.bf16.msra.mxu3 %v1203_v42  ;;  %v1221_v8 = vld [vmem:[#allocation5 + $0xa8] sm:$0xff] }
  0x3d   : > { %570 = vmatpush.bf16.msra.mxu2 %v1194_v27 }
  0x3f   : > { %483 = vmatpush.bf16.msra.mxu1 %v1185_v20 }
  0x40   : > { %398 = vmatpush.bf16.msra.mxu0 %v1176_v9  ;;  %658 = vmatpush.bf16.msra.mxu3 %v1202_v43  ;;  %v1220_v9 = vld [vmem:[#allocation5 + $0xa0] sm:$0xff] }
  0x41   : > { %571 = vmatpush.bf16.msra.mxu2 %v1193_v36 }
  0x43   : > { %484 = vmatpush.bf16.msra.mxu1 %v1184_v21  ;;  %v1217_v21 = vld [vmem:[#allocation5 + $0x88] sm:$0xff] }
  0x44   : > { %659 = vmatpush.bf16.msra.mxu3 %v1201_v52  ;;  %741 = vmatpush.bf16.msrb.mxu0 %v1215_v54 }
  0x45   : > { %572 = vmatpush.bf16.msra.mxu2 %v1192_v37 }
  0x47   : > { %829 = vmatpush.bf16.msrb.mxu1 %v1223_v6 }
  0x48   : > { %660 = vmatpush.bf16.msra.mxu3 %v1200_v53  ;;  %742 = vmatpush.bf16.msrb.mxu0 %v1214_v55 }
  0x4b   : > { %830 = vmatpush.bf16.msrb.mxu1 %v1222_v7 }
  0x4c   : > { %743 = vmatpush.bf16.msrb.mxu0 %v1213_v56 }
  0x4f   : > { %831 = vmatpush.bf16.msrb.mxu1 %v1221_v8 }
  0x50   : > { %744 = vmatpush.bf16.msrb.mxu0 %v1212_v57 }
  0x53   : > { %832 = vmatpush.bf16.msrb.mxu1 %v1220_v9 }
  0x54   : > { %745 = vmatpush.bf16.msrb.mxu0 %v1211_v58 }
  0x57   : > { %833 = vmatpush.bf16.msrb.mxu1 %v1219_v10 }
  0x58   : > { %746 = vmatpush.bf16.msrb.mxu0 %v1210_v59 }
  0x5b   : > { %834 = vmatpush.bf16.msrb.mxu1 %v1218_v11 }
  0x5c   : > { %747 = vmatpush.bf16.msrb.mxu0 %v1209_v4 }
  0x5f   : > { %835 = vmatpush.bf16.msrb.mxu1 %v1217_v21 }
  0x60   : > { %748 = vmatpush.bf16.msrb.mxu0 %v1208_v5 }
  0x63   : > { %836 = vmatpush.bf16.msrb.mxu1 %v1216_v22 }
  0x9c   : > { %v1612_v17 = vpop.permute.xlu0 %318 }
  0x9d   : > { %v321_v18 = vmul.f32 %v1612_v17, %v314_v16 }
  0x9f   : > { %v322_v19 = vpack.c.bf16 %v321_v18, %v321_v18 }
  0xa1   : > { %399 = vmatmul.bf16.vlgmr.msra.gmra.mxu0 %v322_v19 }
 0x11e   : > { %v400_v29 = vpop.f32.mrf.mxu0 }
 0x11f   : > { %v401_v30 = vadd.f32 %v1300_v28, %v400_v29 }
 0x121   : > { %vm404_vm0 = vcmp.gt.f32.partialorder %v401_v30, 0.0  ;;  %v405_v31 = vmul.f32 0.01, %v401_v30 }
 0x123   : > { %v406_v32 = vsel %vm404_vm0, %v401_v30, %v405_v31  ;;  %v1305_v31 = vld [vmem:[#allocation7 + $0x2] ss:$0 sm:$0xff] }
 0x124   : > { %v407_v33 = vmul.f32 %v406_v32, %v1612_v17 }
 0x126   : > { %v402_v34 = vpop.f32.mrf.mxu0  ;;  %v408_v35 = vpack.c.bf16 %v407_v33, %v407_v33 }
 0x128   : > { %485 = vmatmul.bf16.vlgmr.msra.gmra.mxu1 %v408_v35 }
 0x1a5   : > { %v486_v45 = vpop.f32.mrf.mxu1 }
 0x1a6   : > { %v487_v46 = vadd.f32 %v1301_v44, %v486_v45 }
 0x1a8   : > { %vm490_vm1 = vcmp.gt.f32.partialorder %v487_v46, 0.0  ;;  %v491_v47 = vmul.f32 0.01, %v487_v46 }
 0x1aa   : > { %v492_v48 = vsel %vm490_vm1, %v487_v46, %v491_v47 }
 0x1ab   : > { %v493_v49 = vmul.f32 %v492_v48, %v1612_v17 }
 0x1ad   : > { %v488_v50 = vpop.f32.mrf.mxu1  ;;  %v494_v51 = vpack.c.bf16 %v493_v49, %v493_v49 }
 0x1af   : > { %573 = vmatmul.bf16.vlgmr.msra.gmra.mxu2 %v494_v51 }
 0x232   : > { %v574_v61 = vpop.f32.mrf.mxu2 }
 0x233   : > { %v575_v62 = vadd.f32 %v1302_v60, %v574_v61 }
 0x235   : > { %vm578_vm2 = vcmp.gt.f32.partialorder %v575_v62, 0.0  ;;  %v579_v63 = vmul.f32 0.01, %v575_v62 }
 0x237   : > { %v580_v0 = vsel %vm578_vm2, %v575_v62, %v579_v63 }
 0x238   : > { %v581_v1 = vmul.f32 %v580_v0, %v1612_v17 }
 0x23a   : > { %v576_v2 = vpop.f32.mrf.mxu2  ;;  %v582_v3 = vpack.c.bf16 %v581_v1, %v581_v1 }
 0x23c   : > { %661 = vmatmul.bf16.vlgmr.msra.gmra.mxu3 %v582_v3 }
 0x2bf   : > { %v662_v13 = vpop.f32.mrf.mxu3 }
 0x2c0   : > { %v663_v14 = vadd.f32 %v1303_v12, %v662_v13 }
 0x2c2   : > { %vm666_vm3 = vcmp.gt.f32.partialorder %v663_v14, 0.0  ;;  %v667_v15 = vmul.f32 0.01, %v663_v14 }
 0x2c4   : > { %v668_v16 = vsel %vm666_vm3, %v663_v14, %v667_v15 }
 0x2c5   : > { %v669_v18 = vmul.f32 %v668_v16, %v1612_v17 }
 0x2c7   : > { %v664_v19 = vpop.f32.mrf.mxu3  ;;  %v670_v20 = vpack.c.bf16 %v669_v18, %v669_v18 }
 0x2c9   : > { %749 = vmatmul.bf16.vlgmr.msrb.gmra.mxu0 %v670_v20 }
 0x346   : > { %v750_v24 = vpop.f32.mrf.mxu0 }
 0x347   : > { %v751_v25 = vadd.f32 %v1304_v23, %v750_v24 }
 0x349   : > { %vm754_vm4 = vcmp.gt.f32.partialorder %v751_v25, 0.0  ;;  %v755_v26 = vmul.f32 0.01, %v751_v25 }
 0x34b   : > { %v756_v27 = vsel %vm754_vm4, %v751_v25, %v755_v26 }
 0x34c   : > { %v757_v28 = vmul.f32 %v756_v27, %v1612_v17 }
 0x34e   : > { %v752_v29 = vpop.f32.mrf.mxu0  ;;  %v758_v30 = vpack.c.bf16 %v757_v28, %v757_v28 }
 0x350   : > { %837 = vmatmul.bf16.vlgmr.msrb.gmra.mxu1 %v758_v30 }
 0x3cd   : > { %v838_v32 = vpop.f32.mrf.mxu1 }
 0x3ce   : > { %v839_v33 = vadd.f32 %v1305_v31, %v838_v32 }
 0x3d0   : > { %vm842_vm5 = vcmp.gt.f32.partialorder %v839_v33, 0.0  ;;  %v843_v34 = vmul.f32 0.01, %v839_v33 }
 0x3d2   : > { %v844_v35 = vsel %vm842_vm5, %v839_v33, %v843_v34 }
 0x3d3   : > { %v845_v36 = vmul.f32 %v844_v35, %v1612_v17 }
 0x3d5   : > { %v840_v37 = vpop.f32.mrf.mxu1  ;;  %846 = vst [vmem:[%s305_s16] sm:$0xff] %v845_v36 }
 0x3d6   : > { %1423 = shalt.err (!%p1420_p8)
}
 0x3d7   : > { %1236 = dma.vmem_to_hbm [thread:$0]  (%p1549_p5), %s861_s18, 128, %s863_s19, %s848_s25  }
 0x3d8 PF: > { %p1258_p9 = scmp.ge.s32.totalorder %s1466_s24, 2  ;;  %s874_s14 = sand.u32 1, %s1454_s21  }
 0x3d9   : > { %s875_s17 = scalar_lea.sflag [#allocation4], %s874_s14 }
 0x3da   : > { %p1249_p10 = pnand %p1258_p9, %p1553_p6 }
 0x3dc   : > { %p1250_p11 = pneg %p1249_p10 }
 0x3de   : > { %1449 = dma.done.wait (%p1250_p11), %s875_s17, 128  }
 0x3df   : > { %1451 = vsyncadd (%p1250_p11), %s875_s17, 4294967168  ;;  %p18_p12 = scmp.ge.s32.totalorder %s1536_s27, 4   ;;  %s1675_s21 = smov %s1458_s22 }
 0x3e0   : > { %s1676_s22 = smov %s1462_s23  ;;  %s1677_s23 = smov %s1547_s30 }
 0x3e1   : > { %s1678_s24 = smov %s1536_s27  ;;  %20 = sbr.rel (!%p18_p12) target bundleno = 7 (0x7), region = 103 }
 0x3e6   :  { %881 = vsyncpa [#allocation3], 1 }
 0x3e7   :  { %883 = vsyncpa [#allocation3 + $0x1], 1 }
 0x3e8   :  { %884 = vsyncpa [#allocation6], 1 }
 0x3e9   :  { %885 = vsyncpa [#allocation4], 1 }
 0x3ea   :  { %887 = vsyncpa [#allocation4 + $0x1], 1 }

</bundles_post_ra>
